<compile_context>
chip_gen: v5e
topology: v5e:2x2
jax: 0.10.0
libtpu: 0.0.40
codegen_flags: <defaults>
</compile_context>

<pallas_src>
import functools

import numpy as np
import jax
import jax.numpy as jnp
from jax.experimental import pallas as pl
from jax.experimental.pallas import tpu as pltpu

_LANE = 128                            # TPU lane width
_TARGET_BLOCK_BYTES = 2 * 1024 * 1024  # ~2 MiB x blocks: near HBM roofline
_MAX_TN = 8                            # cap batch blocking (bounds scratch/unroll)
_MAX_THW = 64 * _LANE                  # cap lane-tile unroll length


# ----------------------------------------------------------------------------
# Fused kernel: streaming spatial sum+max -> fc1 -> ReLU -> fc2 -> add -> sigmoid
# ----------------------------------------------------------------------------
def _channel_attention_kernel(x_ref, w1_ref, w2_ref, o_ref, sum_acc, max_acc,
                              *, inv_hw, hw, t_hw, needs_mask):
    # x_ref:   (t_n, C, t_hw)   NCHW chunk (C on sublanes, spatial on lanes)
    # w1_ref:  (Cr, C)          fc1 conv weight (native PyTorch layout, squeezed)
    # w2_ref:  (C, Cr)          fc2 conv weight (native PyTorch layout, squeezed)
    # o_ref:   (t_n, C, 1)      per-batch attention gate (written on last step)
    # sum_acc/max_acc: (t_n, C, 128) f32 VMEM accumulators, persistent over grid
    k = pl.program_id(1)

    @pl.when(k == 0)
    def _init():
        sum_acc[...] = jnp.zeros_like(sum_acc)
        max_acc[...] = jnp.full_like(max_acc, -jnp.inf)

    # Pure-VPU accumulation over lane-tile-aligned slices (no per-step XLU reduce).
    for j in range(t_hw // _LANE):
        blk = x_ref[:, :, pl.ds(j * _LANE, _LANE)].astype(jnp.float32)
        if needs_mask:
            col = jax.lax.broadcasted_iota(jnp.int32, blk.shape, 2)
            valid = (k * t_hw + j * _LANE + col) < hw
            bs = jnp.where(valid, blk, 0.0)
            bm = jnp.where(valid, blk, -jnp.inf)
        else:
            bs = blk
            bm = blk
        sum_acc[...] = sum_acc[...] + bs
        max_acc[...] = jnp.maximum(max_acc[...], bm)

    @pl.when(k == pl.num_programs(1) - 1)
    def _finalize():
        w1 = w1_ref[...].astype(jnp.float32)   # (Cr, C)
        w2 = w2_ref[...].astype(jnp.float32)   # (C, Cr)
        t_n = sum_acc.shape[0]
        for n in range(t_n):                   # t_n is small (<= _MAX_TN)
            avg = jnp.sum(sum_acc[n], axis=-1, keepdims=True) * inv_hw   # (C, 1)
            mx = jnp.max(max_acc[n], axis=-1, keepdims=True)             # (C, 1)

            def mlp(v):   # shared MLP, column orientation (channels on sublanes)
                h = jnp.maximum(
                    jnp.dot(w1, v, preferred_element_type=jnp.float32), 0.0)
                return jnp.dot(w2, h, preferred_element_type=jnp.float32)

            logits = mlp(avg) + mlp(mx)                                   # (C, 1)
            o_ref[n] = jax.nn.sigmoid(logits).astype(o_ref.dtype)


# ----------------------------------------------------------------------------
# Tile selection: ~2 MiB blocks, lanes multiple of 128, batch-blocking for small HW
# ----------------------------------------------------------------------------
def _choose_tiles(n, c, hw, itemsize):
    hw_pad = pl.cdiv(hw, _LANE) * _LANE
    image_bytes = c * hw_pad * itemsize
    if image_bytes >= _TARGET_BLOCK_BYTES:
        t_hw = max(_LANE, (_TARGET_BLOCK_BYTES // (c * itemsize)) // _LANE * _LANE)
        t_hw = min(t_hw, hw_pad, _MAX_THW)
        t_n = 1
    else:
        t_hw = min(hw_pad, _MAX_THW)
        want = min(max(_TARGET_BLOCK_BYTES // max(image_bytes, 1), 1), _MAX_TN, n)
        t_n = max(d for d in range(1, int(want) + 1) if n % d == 0)
    return t_n, t_hw


# ----------------------------------------------------------------------------
# Wrapper
# ----------------------------------------------------------------------------
def channel_attention_forward(x_nchw, w1, w2):
    """ChannelAttention forward.

    x_nchw: (N, C, H, W)  activations (f32 or bf16 - bf16 halves HBM traffic)
    w1:     (Cr, C)       == PyTorch fc1 Conv2d(C, Cr, 1, bias=False).weight[:, :, 0, 0]
    w2:     (C, Cr)       == PyTorch fc2 Conv2d(Cr, C, 1, bias=False).weight[:, :, 0, 0]
    returns (N, C, 1, 1)  sigmoid channel gate, dtype = x.dtype
    """
    N, C, H, W = x_nchw.shape
    Cr = w1.shape[0]
    HW = H * W

    # Free reshape, NO transpose: x read from HBM exactly once, inside the kernel.
    x_flat = x_nchw.reshape(N, C, HW)
    itemsize = x_flat.dtype.itemsize

    t_n, t_hw = _choose_tiles(N, C, HW, itemsize)
    n_chunks = pl.cdiv(HW, t_hw)
    needs_mask = (n_chunks * t_hw) != HW

    kernel = functools.partial(
        _channel_attention_kernel,
        inv_hw=1.0 / float(HW), hw=HW, t_hw=t_hw, needs_mask=needs_mask)

    # Advisory cost (bandwidth dominated) + explicit VMEM budget.
    w_bytes = w1.size * w1.dtype.itemsize + w2.size * w2.dtype.itemsize
    out_bytes = N * C * itemsize
    cost = pl.CostEstimate(
        flops=int(N * (3 * C * HW + 8 * C * Cr + 2 * C)),
        transcendentals=int(N * C),
        bytes_accessed=int(x_flat.size * itemsize + w_bytes + out_bytes))

    in_block_bytes = t_n * C * t_hw * itemsize
    acc_bytes = 2 * t_n * C * _LANE * 4
    need = 2 * in_block_bytes + acc_bytes + 2 * w_bytes + 2 * t_n * C * itemsize
    vmem_limit = int(min(64 * 2**20, max(32 * 2**20, 2 * need + (1 << 20))))

    out = pl.pallas_call(
        kernel,
        out_shape=jax.ShapeDtypeStruct((N, C, 1), x_flat.dtype),
        grid=(N // t_n, n_chunks),
        in_specs=[
            pl.BlockSpec((t_n, C, t_hw), lambda b, k: (b, 0, k)),  # x chunk
            pl.BlockSpec((Cr, C), lambda b, k: (0, 0)),            # fc1 weight
            pl.BlockSpec((C, Cr), lambda b, k: (0, 0)),            # fc2 weight
        ],
        out_specs=pl.BlockSpec((t_n, C, 1), lambda b, k: (b, 0, 0)),
        scratch_shapes=[
            pltpu.VMEM((t_n, C, _LANE), jnp.float32),   # running sum (per lane)
            pltpu.VMEM((t_n, C, _LANE), jnp.float32),   # running max (per lane)
        ],
        compiler_params=pltpu.CompilerParams(
            dimension_semantics=("parallel", "arbitrary"),
            vmem_limit_bytes=vmem_limit),
        cost_estimate=cost,
    )(x_flat, w1, w2)

    return out.reshape(N, C, 1, 1)


# ----------------------------------------------------------------------------
# Pure-JAX reference (same math, no Pallas) for a self-consistency check
# ----------------------------------------------------------------------------
def reference_forward(x_nchw, w1, w2):
    avg = jnp.mean(x_nchw.astype(jnp.float32), axis=(2, 3))   # (N, C)
    mx = jnp.max(x_nchw.astype(jnp.float32), axis=(2, 3))     # (N, C)

    def mlp(v):
        return jnp.maximum(v @ w1.T, 0.0) @ w2.T

    out = jax.nn.sigmoid(mlp(avg) + mlp(mx))
    return out[:, :, None, None]


# ----------------------------------------------------------------------------
if __name__ == "__main__":
    # in_planes=128, ratio=16 -> hidden 8; 16x16 spatial, batch 2
    N, C, H, W = 2, 128, 16, 16
    ratio = 16
    Cr = C // ratio

    k0, k1, k2 = jax.random.split(jax.random.PRNGKey(0), 3)
    x = jax.random.normal(k0, (N, C, H, W), jnp.float32)
    # Weights in native (squeezed) PyTorch Conv2d layout: fc1 (Cr, C), fc2 (C, Cr).
    w1 = 0.1 * jax.random.normal(k1, (Cr, C), jnp.float32)
    w2 = 0.1 * jax.random.normal(k2, (C, Cr), jnp.float32)

    # f32 path: strict check against the reference.
    out = jax.block_until_ready(channel_attention_forward(x, w1, w2))
    assert out.shape == (N, C, 1, 1), out.shape
    ref = jax.block_until_ready(reference_forward(x, w1, w2))
    np.testing.assert_allclose(np.asarray(out), np.asarray(ref),
                               rtol=1e-5, atol=1e-5)

    # bf16 activation path (production dtype: half the HBM bytes), relaxed check.
    x_bf16 = x.astype(jnp.bfloat16)
    out_bf = jax.block_until_ready(channel_attention_forward(x_bf16, w1, w2))
    ref_bf = jax.block_until_ready(reference_forward(x_bf16, w1, w2))
    np.testing.assert_allclose(np.asarray(out_bf.astype(jnp.float32)),
                               np.asarray(ref_bf), rtol=5e-2, atol=5e-2)

    print("KERNEL_OK")
</pallas_src>

<mosaic_0001>
module attributes {stable_mosaic.version = 11 : i64} {
  func.func @_channel_attention_kernel(%arg0: i32, %arg1: i32, %arg2: memref<2x128x256xf32, #tpu.memory_space<vmem>>, %arg3: memref<8x128xf32, #tpu.memory_space<vmem>>, %arg4: memref<128x8xf32, #tpu.memory_space<vmem>>, %arg5: memref<2x128x1xf32, #tpu.memory_space<vmem>>, %arg6: memref<2x128x128xf32, #tpu.memory_space<vmem>>, %arg7: memref<2x128x128xf32, #tpu.memory_space<vmem>>) attributes {dimension_semantics = [#tpu.dimension_semantics<parallel>, #tpu.dimension_semantics<arbitrary>], iteration_bounds = array<i64: 1, 1>, scalar_prefetch = 0 : i64, scratch_operands = 2 : i64, tpu.core_type = #tpu.core_type<tc>, window_params = [{transform_indices = @transform_0, window_bounds = array<i64: 2, 128, 256>}, {pipeline_mode = #tpu.pipeline_mode<synchronous>, transform_indices = @transform_1, window_bounds = array<i64: 8, 128>}, {pipeline_mode = #tpu.pipeline_mode<synchronous>, transform_indices = @transform_2, window_bounds = array<i64: 128, 8>}, {transform_indices = @transform_3, window_bounds = array<i64: 2, 128, 1>}]} {
    %c0_i32 = arith.constant 0 : i32
    %0 = arith.cmpi eq, %arg1, %c0_i32 : i32
    %1 = arith.extui %0 : i1 to i32
    %c0_i32_0 = arith.constant 0 : i32
    %2 = arith.cmpi ne, %1, %c0_i32_0 : i32
    scf.if %2 {
      %cst = arith.constant 0.000000e+00 : f32
      %20 = vector.broadcast %cst : f32 to vector<2x128x128xf32>
      %c0_31 = arith.constant 0 : index
      %c0_32 = arith.constant 0 : index
      %c0_33 = arith.constant 0 : index
      %21 = vector.load %arg6[%c0_31, %c0_32, %c0_33] : memref<2x128x128xf32, #tpu.memory_space<vmem>>, vector<2x128x128xf32>
      tpu.vector_store %arg6[%c0_31, %c0_32, %c0_33], %20 {strides = array<i32>} : memref<2x128x128xf32, #tpu.memory_space<vmem>>, vector<2x128x128xf32>,
      %cst_34 = arith.constant 0xFF800000 : f32
      %22 = vector.broadcast %cst_34 : f32 to vector<2x128x128xf32>
      %c0_35 = arith.constant 0 : index
      %c0_36 = arith.constant 0 : index
      %c0_37 = arith.constant 0 : index
      %23 = vector.load %arg7[%c0_35, %c0_36, %c0_37] : memref<2x128x128xf32, #tpu.memory_space<vmem>>, vector<2x128x128xf32>
      tpu.vector_store %arg7[%c0_35, %c0_36, %c0_37], %22 {strides = array<i32>} : memref<2x128x128xf32, #tpu.memory_space<vmem>>, vector<2x128x128xf32>,
    } else {
    }
    %c0 = arith.constant 0 : index
    %c0_1 = arith.constant 0 : index
    %c0_2 = arith.constant 0 : index
    %3 = vector.load %arg2[%c0, %c0_1, %c0_2] : memref<2x128x256xf32, #tpu.memory_space<vmem>>, vector<2x128x128xf32>
    %c0_3 = arith.constant 0 : index
    %c0_4 = arith.constant 0 : index
    %c0_5 = arith.constant 0 : index
    %4 = vector.load %arg6[%c0_3, %c0_4, %c0_5] : memref<2x128x128xf32, #tpu.memory_space<vmem>>, vector<2x128x128xf32>
    %5 = arith.addf %4, %3 : vector<2x128x128xf32>
    %c0_6 = arith.constant 0 : index
    %c0_7 = arith.constant 0 : index
    %c0_8 = arith.constant 0 : index
    %6 = vector.load %arg6[%c0_6, %c0_7, %c0_8] : memref<2x128x128xf32, #tpu.memory_space<vmem>>, vector<2x128x128xf32>
    tpu.vector_store %arg6[%c0_6, %c0_7, %c0_8], %5 {strides = array<i32>} : memref<2x128x128xf32, #tpu.memory_space<vmem>>, vector<2x128x128xf32>,
    %c0_9 = arith.constant 0 : index
    %c0_10 = arith.constant 0 : index
    %c0_11 = arith.constant 0 : index
    %7 = vector.load %arg7[%c0_9, %c0_10, %c0_11] : memref<2x128x128xf32, #tpu.memory_space<vmem>>, vector<2x128x128xf32>
    %8 = arith.maximumf %7, %3 : vector<2x128x128xf32>
    %c0_12 = arith.constant 0 : index
    %c0_13 = arith.constant 0 : index
    %c0_14 = arith.constant 0 : index
    %9 = vector.load %arg7[%c0_12, %c0_13, %c0_14] : memref<2x128x128xf32, #tpu.memory_space<vmem>>, vector<2x128x128xf32>
    tpu.vector_store %arg7[%c0_12, %c0_13, %c0_14], %8 {strides = array<i32>} : memref<2x128x128xf32, #tpu.memory_space<vmem>>, vector<2x128x128xf32>,
    %c0_15 = arith.constant 0 : index
    %c0_16 = arith.constant 0 : index
    %c128 = arith.constant 128 : index
    %10 = vector.load %arg2[%c0_15, %c0_16, %c128] : memref<2x128x256xf32, #tpu.memory_space<vmem>>, vector<2x128x128xf32>
    %c0_17 = arith.constant 0 : index
    %c0_18 = arith.constant 0 : index
    %c0_19 = arith.constant 0 : index
    %11 = vector.load %arg6[%c0_17, %c0_18, %c0_19] : memref<2x128x128xf32, #tpu.memory_space<vmem>>, vector<2x128x128xf32>
    %12 = arith.addf %11, %10 : vector<2x128x128xf32>
    %c0_20 = arith.constant 0 : index
    %c0_21 = arith.constant 0 : index
    %c0_22 = arith.constant 0 : index
    %13 = vector.load %arg6[%c0_20, %c0_21, %c0_22] : memref<2x128x128xf32, #tpu.memory_space<vmem>>, vector<2x128x128xf32>
    tpu.vector_store %arg6[%c0_20, %c0_21, %c0_22], %12 {strides = array<i32>} : memref<2x128x128xf32, #tpu.memory_space<vmem>>, vector<2x128x128xf32>,
    %c0_23 = arith.constant 0 : index
    %c0_24 = arith.constant 0 : index
    %c0_25 = arith.constant 0 : index
    %14 = vector.load %arg7[%c0_23, %c0_24, %c0_25] : memref<2x128x128xf32, #tpu.memory_space<vmem>>, vector<2x128x128xf32>
    %15 = arith.maximumf %14, %10 : vector<2x128x128xf32>
    %c0_26 = arith.constant 0 : index
    %c0_27 = arith.constant 0 : index
    %c0_28 = arith.constant 0 : index
    %16 = vector.load %arg7[%c0_26, %c0_27, %c0_28] : memref<2x128x128xf32, #tpu.memory_space<vmem>>, vector<2x128x128xf32>
    tpu.vector_store %arg7[%c0_26, %c0_27, %c0_28], %15 {strides = array<i32>} : memref<2x128x128xf32, #tpu.memory_space<vmem>>, vector<2x128x128xf32>,
    %c0_i32_29 = arith.constant 0 : i32
    %17 = arith.cmpi eq, %arg1, %c0_i32_29 : i32
    %18 = arith.extui %17 : i1 to i32
    %c0_i32_30 = arith.constant 0 : i32
    %19 = arith.cmpi ne, %18, %c0_i32_30 : i32
    scf.if %19 {
      %c0_31 = arith.constant 0 : index
      %c0_32 = arith.constant 0 : index
      %20 = vector.load %arg3[%c0_31, %c0_32] : memref<8x128xf32, #tpu.memory_space<vmem>>, vector<8x128xf32>
      %c0_33 = arith.constant 0 : index
      %c0_34 = arith.constant 0 : index
      %21 = vector.load %arg4[%c0_33, %c0_34] : memref<128x8xf32, #tpu.memory_space<vmem>>, vector<128x8xf32>
      %c0_35 = arith.constant 0 : index
      %c0_36 = arith.constant 0 : index
      %c0_37 = arith.constant 0 : index
      %22 = vector.load %arg6[%c0_35, %c0_36, %c0_37] : memref<2x128x128xf32, #tpu.memory_space<vmem>>, vector<1x128x128xf32>
      %23 = vector.shape_cast %22 : vector<1x128x128xf32> to vector<128x128xf32>
      %cst = arith.constant dense<0.000000e+00> : vector<128xf32>
      %24 = vector.multi_reduction <add>, %23, %cst [1] : vector<128x128xf32> to vector<128xf32>
      %25 = vector.shape_cast %24 : vector<128xf32> to vector<128x1xf32>
      %cst_38 = arith.constant 3.906250e-03 : f32
      %26 = vector.broadcast %cst_38 : f32 to vector<128x1xf32>
      %27 = arith.mulf %25, %26 : vector<128x1xf32>
      %c0_39 = arith.constant 0 : index
      %c0_40 = arith.constant 0 : index
      %c0_41 = arith.constant 0 : index
      %28 = vector.load %arg7[%c0_39, %c0_40, %c0_41] : memref<2x128x128xf32, #tpu.memory_space<vmem>>, vector<1x128x128xf32>
      %29 = vector.shape_cast %28 : vector<1x128x128xf32> to vector<128x128xf32>
      %cst_42 = arith.constant dense<0xFF800000> : vector<128xf32>
      %30 = vector.multi_reduction <maximumf>, %29, %cst_42 [1] : vector<128x128xf32> to vector<128xf32>
      %31 = vector.shape_cast %30 : vector<128xf32> to vector<128x1xf32>
      %cst_43 = arith.constant dense<0.000000e+00> : vector<8x1xf32>
      %32 = tpu.matmul %20, %27, %cst_43 {dimension_numbers = #tpu.dot_dimension_numbers<[1], [0], [0], [1], [0, 0, 1, 1], [], []>} : vector<8x128xf32>, vector<128x1xf32>, vector<8x1xf32> -> vector<8x1xf32>
      %cst_44 = arith.constant 0.000000e+00 : f32
      %33 = vector.broadcast %cst_44 : f32 to vector<8x1xf32>
      %34 = arith.maximumf %32, %33 : vector<8x1xf32>
      %cst_45 = arith.constant dense<0.000000e+00> : vector<128x1xf32>
      %35 = tpu.matmul %21, %34, %cst_45 {dimension_numbers = #tpu.dot_dimension_numbers<[1], [0], [0], [1], [0, 0, 1, 1], [], []>} : vector<128x8xf32>, vector<8x1xf32>, vector<128x1xf32> -> vector<128x1xf32>
      %cst_46 = arith.constant dense<0.000000e+00> : vector<8x1xf32>
      %36 = tpu.matmul %20, %31, %cst_46 {dimension_numbers = #tpu.dot_dimension_numbers<[1], [0], [0], [1], [0, 0, 1, 1], [], []>} : vector<8x128xf32>, vector<128x1xf32>, vector<8x1xf32> -> vector<8x1xf32>
      %cst_47 = arith.constant 0.000000e+00 : f32
      %37 = vector.broadcast %cst_47 : f32 to vector<8x1xf32>
      %38 = arith.maximumf %36, %37 : vector<8x1xf32>
      %cst_48 = arith.constant dense<0.000000e+00> : vector<128x1xf32>
      %39 = tpu.matmul %21, %38, %cst_48 {dimension_numbers = #tpu.dot_dimension_numbers<[1], [0], [0], [1], [0, 0, 1, 1], [], []>} : vector<128x8xf32>, vector<8x1xf32>, vector<128x1xf32> -> vector<128x1xf32>
      %40 = arith.addf %35, %39 : vector<128x1xf32>
      %41 = arith.negf %40 : vector<128x1xf32>
      %42 = math.exp %41 : vector<128x1xf32>
      %cst_49 = arith.constant 1.000000e+00 : f32
      %43 = vector.broadcast %cst_49 : f32 to vector<128x1xf32>
      %44 = arith.addf %43, %42 : vector<128x1xf32>
      %45 = arith.divf %43, %44 : vector<128x1xf32>
      %c0_50 = arith.constant 0 : index
      %c0_51 = arith.constant 0 : index
      %c0_52 = arith.constant 0 : index
      %46 = vector.load %arg5[%c0_50, %c0_51, %c0_52] : memref<2x128x1xf32, #tpu.memory_space<vmem>>, vector<1x128x1xf32>
      %47 = vector.shape_cast %46 : vector<1x128x1xf32> to vector<128x1xf32>
      %48 = vector.shape_cast %45 : vector<128x1xf32> to vector<1x128x1xf32>
      tpu.vector_store %arg5[%c0_50, %c0_51, %c0_52], %48 {strides = array<i32>} : memref<2x128x1xf32, #tpu.memory_space<vmem>>, vector<1x128x1xf32>,
      %c1 = arith.constant 1 : index
      %c0_53 = arith.constant 0 : index
      %c0_54 = arith.constant 0 : index
      %49 = vector.load %arg6[%c1, %c0_53, %c0_54] : memref<2x128x128xf32, #tpu.memory_space<vmem>>, vector<1x128x128xf32>
      %50 = vector.shape_cast %49 : vector<1x128x128xf32> to vector<128x128xf32>
      %cst_55 = arith.constant dense<0.000000e+00> : vector<128xf32>
      %51 = vector.multi_reduction <add>, %50, %cst_55 [1] : vector<128x128xf32> to vector<128xf32>
      %52 = vector.shape_cast %51 : vector<128xf32> to vector<128x1xf32>
      %cst_56 = arith.constant 3.906250e-03 : f32
      %53 = vector.broadcast %cst_56 : f32 to vector<128x1xf32>
      %54 = arith.mulf %52, %53 : vector<128x1xf32>
      %c1_57 = arith.constant 1 : index
      %c0_58 = arith.constant 0 : index
      %c0_59 = arith.constant 0 : index
      %55 = vector.load %arg7[%c1_57, %c0_58, %c0_59] : memref<2x128x128xf32, #tpu.memory_space<vmem>>, vector<1x128x128xf32>
      %56 = vector.shape_cast %55 : vector<1x128x128xf32> to vector<128x128xf32>
      %cst_60 = arith.constant dense<0xFF800000> : vector<128xf32>
      %57 = vector.multi_reduction <maximumf>, %56, %cst_60 [1] : vector<128x128xf32> to vector<128xf32>
      %58 = vector.shape_cast %57 : vector<128xf32> to vector<128x1xf32>
      %cst_61 = arith.constant dense<0.000000e+00> : vector<8x1xf32>
      %59 = tpu.matmul %20, %54, %cst_61 {dimension_numbers = #tpu.dot_dimension_numbers<[1], [0], [0], [1], [0, 0, 1, 1], [], []>} : vector<8x128xf32>, vector<128x1xf32>, vector<8x1xf32> -> vector<8x1xf32>
      %cst_62 = arith.constant 0.000000e+00 : f32
      %60 = vector.broadcast %cst_62 : f32 to vector<8x1xf32>
      %61 = arith.maximumf %59, %60 : vector<8x1xf32>
      %cst_63 = arith.constant dense<0.000000e+00> : vector<128x1xf32>
      %62 = tpu.matmul %21, %61, %cst_63 {dimension_numbers = #tpu.dot_dimension_numbers<[1], [0], [0], [1], [0, 0, 1, 1], [], []>} : vector<128x8xf32>, vector<8x1xf32>, vector<128x1xf32> -> vector<128x1xf32>
      %cst_64 = arith.constant dense<0.000000e+00> : vector<8x1xf32>
      %63 = tpu.matmul %20, %58, %cst_64 {dimension_numbers = #tpu.dot_dimension_numbers<[1], [0], [0], [1], [0, 0, 1, 1], [], []>} : vector<8x128xf32>, vector<128x1xf32>, vector<8x1xf32> -> vector<8x1xf32>
      %cst_65 = arith.constant 0.000000e+00 : f32
      %64 = vector.broadcast %cst_65 : f32 to vector<8x1xf32>
      %65 = arith.maximumf %63, %64 : vector<8x1xf32>
      %cst_66 = arith.constant dense<0.000000e+00> : vector<128x1xf32>
      %66 = tpu.matmul %21, %65, %cst_66 {dimension_numbers = #tpu.dot_dimension_numbers<[1], [0], [0], [1], [0, 0, 1, 1], [], []>} : vector<128x8xf32>, vector<8x1xf32>, vector<128x1xf32> -> vector<128x1xf32>
      %67 = arith.addf %62, %66 : vector<128x1xf32>
      %68 = arith.negf %67 : vector<128x1xf32>
      %69 = math.exp %68 : vector<128x1xf32>
      %cst_67 = arith.constant 1.000000e+00 : f32
      %70 = vector.broadcast %cst_67 : f32 to vector<128x1xf32>
      %71 = arith.addf %70, %69 : vector<128x1xf32>
      %72 = arith.divf %70, %71 : vector<128x1xf32>
      %c1_68 = arith.constant 1 : index
      %c0_69 = arith.constant 0 : index
      %c0_70 = arith.constant 0 : index
      %73 = vector.load %arg5[%c1_68, %c0_69, %c0_70] : memref<2x128x1xf32, #tpu.memory_space<vmem>>, vector<1x128x1xf32>
      %74 = vector.shape_cast %73 : vector<1x128x1xf32> to vector<128x1xf32>
      %75 = vector.shape_cast %72 : vector<128x1xf32> to vector<1x128x1xf32>
      tpu.vector_store %arg5[%c1_68, %c0_69, %c0_70], %75 {strides = array<i32>} : memref<2x128x1xf32, #tpu.memory_space<vmem>>, vector<1x128x1xf32>,
    } else {
    }
    return
  }
  func.func @transform_0(%arg0: i32, %arg1: i32) -> (i32, i32, i32) {
    %c0_i32 = arith.constant 0 : i32
    %c0_i32_0 = arith.constant 0 : i32
    return %arg0, %c0_i32, %arg1 : i32, i32, i32
  }
  func.func @transform_1(%arg0: i32, %arg1: i32) -> (i32, i32) {
    %c0_i32 = arith.constant 0 : i32
    %c0_i32_0 = arith.constant 0 : i32
    %c0_i32_1 = arith.constant 0 : i32
    return %c0_i32, %c0_i32_0 : i32, i32
  }
  func.func @transform_2(%arg0: i32, %arg1: i32) -> (i32, i32) {
    %c0_i32 = arith.constant 0 : i32
    %c0_i32_0 = arith.constant 0 : i32
    %c0_i32_1 = arith.constant 0 : i32
    return %c0_i32, %c0_i32_0 : i32, i32
  }
  func.func @transform_3(%arg0: i32, %arg1: i32) -> (i32, i32, i32) {
    %c0_i32 = arith.constant 0 : i32
    %c0_i32_0 = arith.constant 0 : i32
    %c0_i32_1 = arith.constant 0 : i32
    return %arg0, %c0_i32, %c0_i32_0 : i32, i32, i32
  }
}

</mosaic_0001>

<bundles_post_ra>
// kernel: tpu_custom_call.1
= control target key start
LH: loop header
LB: loop body
LE: loop exit
PB: predicated region body
PF: predicated region fallthrough
CT: control target
= control target key end

     0   :  { %8 = vsyncpa [#allocation5], 0  ;;  %s2101_s15 = smov [#allocation4]   ;;  %s2102_s17 = smov 256   ;;  %s2853_s0 = inlined_call_operand.hbm [shape: f32[2,128,256], index: 0, kind: input, shape index: {}]   ;;  %s2854_s1 = inlined_call_operand.vmem [shape: f32[8,128], index: 1, kind: input, shape index: {}]   ;;  %s2855_s2 = inlined_call_operand.vmem [shape: f32[128,8], index: 2, kind: input, shape index: {}]   ;;  %s2856_s3 = inlined_call_operand.vmem [shape: f32[2,128,1], index: 3, kind: output, shape index: {}]  }
   0x1   :  { %s13_s14 = sshll.u32 %s2853_s0, 4  ;;  %s15_s16 = sshll.u32 %s2101_s15, 4  ;;  %s14_s14 = int_to_ptr.hbm [resolvable:$true] %s13_s14  ;;  %s16_s16 = int_to_ptr.vmem [resolvable:$true] %s15_s16 }
   0x2   :  { %s2103_s18 = smov 16  }
   0x3   :  { %21 = dma.hbm_to_vmem [thread:$0]  %s14_s14, 8192, %s16_s16, [#allocation5], %s2102_s17, %s2102_s17, %s2103_s18  }
   0x4   :  { %2099 = dma.done.wait [#allocation5], 8192  }
   0x5   :  { %2100 = vsyncadd [#allocation5], 4294959104  ;;  %v113_v0 = vld [vmem:[#allocation4 + $0xf0] sm:$0xff]  ;;  %v337_v1 = vld [vmem:[#allocation4 + $0xf8] sm:$0xff]  ;;  %vm720_vm0 = vcmask 64512   ;;  %vm1203_vm5 = vcmask 7168  }
   0x6   :  { %v112_v2 = vld [vmem:[#allocation4 + $0xe0] sm:$0xff]  ;;  %v401_v3 = vadd.f32 %v337_v1, %v113_v0  ;;  %v497_v4 = vmax.f32 %v113_v0, %v337_v1  ;;  %v336_v5 = vld [vmem:[#allocation4 + $0xe8] sm:$0xff]  ;;  %v111_v7 = vld [vmem:[#allocation4 + $0xd0] sm:$0xff] }
   0x7   :  { %v496_v6 = vmax.f32 %v112_v2, %v336_v5  ;;  %v335_v8 = vld [vmem:[#allocation4 + $0xd8] sm:$0xff]  ;;  %v110_v9 = vld [vmem:[#allocation4 + $0xc0] sm:$0xff]  ;;  %v334_v10 = vld [vmem:[#allocation4 + $0xc8] sm:$0xff]  ;;  %v400_v11 = vadd.f32 %v336_v5, %v112_v2 }
   0x8   :  { %612 = vadd.xlane.f32.xlu0 %v401_v3  ;;  %676 = vmax.xlane.f32.xlu1 %v497_v4  ;;  %v399_v12 = vadd.f32 %v335_v8, %v111_v7  ;;  %v398_v13 = vadd.f32 %v334_v10, %v110_v9  ;;  %v109_v14 = vld [vmem:[#allocation4 + $0xb0] sm:$0xff]  ;;  %v333_v15 = vld [vmem:[#allocation4 + $0xb8] sm:$0xff]  ;;  %v495_v16 = vmax.f32 %v111_v7, %v335_v8  ;;  %v108_v19 = vld [vmem:[#allocation4 + $0xa0] sm:$0xff] }
   0x9   :  { %674 = vmax.xlane.f32.xlu2 %v496_v6  ;;  %v397_v17 = vadd.f32 %v333_v15, %v109_v14  ;;  %v494_v18 = vmax.f32 %v110_v9, %v334_v10  ;;  %v332_v20 = vld [vmem:[#allocation4 + $0xa8] sm:$0xff]  ;;  %v107_v21 = vld [vmem:[#allocation4 + $0x90] sm:$0xff]  ;;  %v331_v22 = vld [vmem:[#allocation4 + $0x98] sm:$0xff]  ;;  %v493_v24 = vmax.f32 %v109_v14, %v333_v15 }
   0xa   :  { %v396_v23 = vadd.f32 %v332_v20, %v108_v19  ;;  %v395_v25 = vadd.f32 %v331_v22, %v107_v21  ;;  %v129_v26 = vld [vmem:[#allocation4 + $0x1f0] sm:$0xff]  ;;  %v353_v27 = vld [vmem:[#allocation4 + $0x1f8] sm:$0xff]  ;;  %v106_v28 = vld [vmem:[#allocation4 + $0x80] sm:$0xff]  ;;  %v492_v30 = vmax.f32 %v108_v19, %v332_v20  ;;  %v491_v35 = vmax.f32 %v107_v21, %v331_v22 }
   0xb   :  { %v330_v29 = vld [vmem:[#allocation4 + $0x88] sm:$0xff]  ;;  %v417_v31 = vadd.f32 %v353_v27, %v129_v26  ;;  %v128_v33 = vld [vmem:[#allocation4 + $0x1e0] sm:$0xff]  ;;  %v513_v37 = vmax.f32 %v129_v26, %v353_v27  ;;  %v105_v38 = vld [vmem:[#allocation4 + $0x70] sm:$0xff] }
   0xc   :  { %v394_v32 = vadd.f32 %v330_v29, %v106_v28  ;;  %v352_v34 = vld [vmem:[#allocation4 + $0x1e8] sm:$0xff]  ;;  %v329_v39 = vld [vmem:[#allocation4 + $0x78] sm:$0xff]  ;;  %v127_v40 = vld [vmem:[#allocation4 + $0x1d0] sm:$0xff]  ;;  %v490_v43 = vmax.f32 %v106_v28, %v330_v29 }
   0xd   :  { %v416_v36 = vadd.f32 %v352_v34, %v128_v33  ;;  %v351_v41 = vld [vmem:[#allocation4 + $0x1d8] sm:$0xff]  ;;  %v393_v42 = vadd.f32 %v329_v39, %v105_v38  ;;  %v104_v45 = vld [vmem:[#allocation4 + $0x60] sm:$0xff]  ;;  %v328_v46 = vld [vmem:[#allocation4 + $0x68] sm:$0xff]  ;;  %v512_v47 = vmax.f32 %v128_v33, %v352_v34  ;;  %v489_v49 = vmax.f32 %v105_v38, %v329_v39 }
   0xe   :  { %v415_v44 = vadd.f32 %v351_v41, %v127_v40  ;;  %v392_v48 = vadd.f32 %v328_v46, %v104_v45  ;;  %v126_v50 = vld [vmem:[#allocation4 + $0x1c0] sm:$0xff]  ;;  %v350_v51 = vld [vmem:[#allocation4 + $0x1c8] sm:$0xff]  ;;  %v103_v52 = vld [vmem:[#allocation4 + $0x50] sm:$0xff]  ;;  %v511_v55 = vmax.f32 %v127_v40, %v351_v41  ;;  %v488_v59 = vmax.f32 %v104_v45, %v328_v46 }
   0xf   :  { %v327_v53 = vld [vmem:[#allocation4 + $0x58] sm:$0xff]  ;;  %v414_v54 = vadd.f32 %v350_v51, %v126_v50  ;;  %v125_v57 = vld [vmem:[#allocation4 + $0x1b0] sm:$0xff]  ;;  %v510_v61 = vmax.f32 %v126_v50, %v350_v51  ;;  %v102_v62 = vld [vmem:[#allocation4 + $0x40] sm:$0xff] }
  0x10   :  { %610 = vadd.xlane.f32.xlu0 %v400_v11  ;;  %608 = vadd.xlane.f32.xlu1 %v399_v12  ;;  %v391_v56 = vadd.f32 %v327_v53, %v103_v52  ;;  %v349_v58 = vld [vmem:[#allocation4 + $0x1b8] sm:$0xff]  ;;  %v326_v63 = vld [vmem:[#allocation4 + $0x48] sm:$0xff]  ;;  %v124_v0 = vld [vmem:[#allocation4 + $0x1a0] sm:$0xff]  ;;  %v487_v3 = vmax.f32 %v103_v52, %v327_v53 }
  0x11   :  { %606 = vadd.xlane.f32.xlu2 %v398_v13  ;;  %v413_v60 = vadd.f32 %v349_v58, %v125_v57  ;;  %v348_v1 = vld [vmem:[#allocation4 + $0x1a8] sm:$0xff]  ;;  %v390_v2 = vadd.f32 %v326_v63, %v102_v62  ;;  %v101_v5 = vld [vmem:[#allocation4 + $0x30] sm:$0xff]  ;;  %v325_v6 = vld [vmem:[#allocation4 + $0x38] sm:$0xff]  ;;  %v509_v7 = vmax.f32 %v125_v57, %v349_v58  ;;  %v486_v9 = vmax.f32 %v102_v62, %v326_v63 }
  0x12   :  { %v412_v4 = vadd.f32 %v348_v1, %v124_v0  ;;  %v389_v8 = vadd.f32 %v325_v6, %v101_v5  ;;  %v123_v10 = vld [vmem:[#allocation4 + $0x190] sm:$0xff]  ;;  %v347_v11 = vld [vmem:[#allocation4 + $0x198] sm:$0xff]  ;;  %v100_v12 = vld [vmem:[#allocation4 + $0x20] sm:$0xff]  ;;  %v508_v15 = vmax.f32 %v124_v0, %v348_v1  ;;  %v485_v19 = vmax.f32 %v101_v5, %v325_v6 }
  0x13   :  { %v324_v13 = vld [vmem:[#allocation4 + $0x28] sm:$0xff]  ;;  %v411_v14 = vadd.f32 %v347_v11, %v123_v10  ;;  %v507_v21 = vmax.f32 %v123_v10, %v347_v11  ;;  %v99_v22 = vld [vmem:[#allocation4 + $0x10] sm:$0xff]  ;;  %v98_v29 = vld [vmem:[#allocation4] sm:$0xff] }
  0x14   :  { %v484_v27 = vmax.f32 %v100_v12, %v324_v13  ;;  %v120_v38 = vld [vmem:[#allocation4 + $0x160] sm:$0xff]  ;;  %v344_v39 = vld [vmem:[#allocation4 + $0x168] sm:$0xff]  ;;  %v343_v50 = vld [vmem:[#allocation4 + $0x158] sm:$0xff] }
  0x15   :  { %v118_v51 = vld [vmem:[#allocation4 + $0x140] sm:$0xff]  ;;  %v342_v52 = vld [vmem:[#allocation4 + $0x148] sm:$0xff] }
  0x16   :  { %v406_v58 = vadd.f32 %v342_v52, %v118_v51  ;;  %v116_v6 = vld [vmem:[#allocation4 + $0x120] sm:$0xff] }
  0x18   :  { %672 = vmax.xlane.f32.xlu0 %v495_v16  ;;  %604 = vadd.xlane.f32.xlu1 %v397_v17  ;;  %v388_v16 = vadd.f32 %v324_v13, %v100_v12  ;;  %v122_v17 = vld [vmem:[#allocation4 + $0x180] sm:$0xff] }
  0x19   :  { %670 = vmax.xlane.f32.xlu2 %v494_v18  ;;  %v346_v18 = vld [vmem:[#allocation4 + $0x188] sm:$0xff] }
  0x1a   :  { %v410_v20 = vadd.f32 %v346_v18, %v122_v17  ;;  %v506_v34 = vmax.f32 %v122_v17, %v346_v18  ;;  %v114_v18 = vld [vmem:[#allocation4 + $0x100] sm:$0xff] }
  0x20   :  { %602 = vadd.xlane.f32.xlu0 %v396_v23  ;;  %668 = vmax.xlane.f32.xlu1 %v493_v24  ;;  %v323_v23 = vld [vmem:[#allocation4 + $0x18] sm:$0xff]  ;;  %v121_v24 = vld [vmem:[#allocation4 + $0x170] sm:$0xff] }
  0x21   :  { %600 = vadd.xlane.f32.xlu2 %v395_v25  ;;  %v345_v25 = vld [vmem:[#allocation4 + $0x178] sm:$0xff]  ;;  %v387_v26 = vadd.f32 %v323_v23, %v99_v22 }
  0x22   :  { %v409_v28 = vadd.f32 %v345_v25, %v121_v24 }
  0x28   :  { %666 = vmax.xlane.f32.xlu0 %v492_v30  ;;  %1267 = vadd.xlane.f32.xlu1 %v417_v31  ;;  %v322_v30 = vld [vmem:[#allocation4 + $0x8] sm:$0xff] }
  0x29   :  { %598 = vadd.xlane.f32.xlu2 %v394_v32  ;;  %v482_v46 = vmax.f32 %v98_v29, %v322_v30 }
  0x30   :  { %664 = vmax.xlane.f32.xlu0 %v491_v35  ;;  %1265 = vadd.xlane.f32.xlu1 %v416_v36  ;;  %v386_v36 = vadd.f32 %v322_v30, %v98_v29 }
  0x31   :  { %1332 = vmax.xlane.f32.xlu2 %v513_v37  ;;  %v483_v37 = vmax.f32 %v99_v22, %v323_v23 }
  0x38   :  { %596 = vadd.xlane.f32.xlu0 %v393_v42  ;;  %662 = vmax.xlane.f32.xlu1 %v490_v43 }
  0x39   :  { %1263 = vadd.xlane.f32.xlu2 %v415_v44  ;;  %v408_v44 = vadd.f32 %v344_v39, %v120_v38 }
  0x40   :  { %1330 = vmax.xlane.f32.xlu0 %v512_v47  ;;  %594 = vadd.xlane.f32.xlu1 %v392_v48  ;;  %v505_v47 = vmax.f32 %v121_v24, %v345_v25 }
  0x41   :  { %660 = vmax.xlane.f32.xlu2 %v489_v49  ;;  %v119_v49 = vld [vmem:[#allocation4 + $0x150] sm:$0xff] }
  0x42   :  { %v503_v1 = vmax.f32 %v119_v49, %v343_v50 }
  0x48   :  { %1261 = vadd.xlane.f32.xlu0 %v414_v54  ;;  %1328 = vmax.xlane.f32.xlu1 %v511_v55  ;;  %v407_v55 = vadd.f32 %v343_v50, %v119_v49 }
  0x49   :  { %592 = vadd.xlane.f32.xlu2 %v391_v56 }
  0x50   :  { %658 = vmax.xlane.f32.xlu0 %v488_v59  ;;  %1259 = vadd.xlane.f32.xlu1 %v413_v60  ;;  %v504_v59 = vmax.f32 %v120_v38, %v344_v39  ;;  %v117_v60 = vld [vmem:[#allocation4 + $0x130] sm:$0xff] }
  0x51   :  { %1326 = vmax.xlane.f32.xlu2 %v510_v61  ;;  %v341_v61 = vld [vmem:[#allocation4 + $0x138] sm:$0xff] }
  0x52   :  { %v405_v5 = vadd.f32 %v341_v61, %v117_v60  ;;  %v501_v17 = vmax.f32 %v117_v60, %v341_v61 }
  0x58   :  { %590 = vadd.xlane.f32.xlu0 %v390_v2  ;;  %656 = vmax.xlane.f32.xlu1 %v487_v3 }
  0x59   :  { %1257 = vadd.xlane.f32.xlu2 %v412_v4  ;;  %v502_v4 = vmax.f32 %v118_v51, %v342_v52 }
  0x60   :  { %1324 = vmax.xlane.f32.xlu0 %v509_v7  ;;  %588 = vadd.xlane.f32.xlu1 %v389_v8  ;;  %v340_v7 = vld [vmem:[#allocation4 + $0x128] sm:$0xff]  ;;  %v115_v8 = vld [vmem:[#allocation4 + $0x110] sm:$0xff] }
  0x61   :  { %654 = vmax.xlane.f32.xlu2 %v486_v9  ;;  %v339_v9 = vld [vmem:[#allocation4 + $0x118] sm:$0xff]  ;;  %v404_v12 = vadd.f32 %v340_v7, %v116_v6  ;;  %v500_v22 = vmax.f32 %v116_v6, %v340_v7 }
  0x62   :  { %v499_v25 = vmax.f32 %v115_v8, %v339_v9 }
  0x68   :  { %1255 = vadd.xlane.f32.xlu0 %v411_v14  ;;  %1322 = vmax.xlane.f32.xlu1 %v508_v15 }
  0x69   :  { %586 = vadd.xlane.f32.xlu2 %v388_v16  ;;  %v403_v16 = vadd.f32 %v339_v9, %v115_v8  ;;  %v549_v9 = vld [vmem:[%s2854_s1] sm:$0xff] }
  0x70   :  { %652 = vmax.xlane.f32.xlu0 %v485_v19  ;;  %1253 = vadd.xlane.f32.xlu1 %v410_v20  ;;  %v338_v19 = vld [vmem:[#allocation4 + $0x108] sm:$0xff] }
  0x71   :  { %1320 = vmax.xlane.f32.xlu2 %v507_v21  ;;  %v498_v30 = vmax.f32 %v114_v18, %v338_v19 }
  0x78   :  { %584 = vadd.xlane.f32.xlu0 %v387_v26  ;;  %650 = vmax.xlane.f32.xlu1 %v484_v27  ;;  %v402_v26 = vadd.f32 %v338_v19, %v114_v18 }
  0x79   :  { %1251 = vadd.xlane.f32.xlu2 %v409_v28 }
  0x7b   :  { %v613_v31 = vpop.xlane.xlu0 %612  ;;  %v677_v32 = vpop.xlane.xlu1 %676 }
  0x7c   :  { %v629_v33 = vmul.f32 0.00390625, %v613_v31  ;;  %699 = vmatpush.msra.mxu3 %v677_v32  ;;  %v675_v35 = vpop.xlane.xlu2 %674 }
  0x7e   :  { %678 = vmatpush.msra.mxu2 %v629_v33  ;;  %700 = vmatpush.msra.mxu3 %v675_v35 }
  0x80   :  { %1318 = vmax.xlane.f32.xlu0 %v506_v34  ;;  %582 = vadd.xlane.f32.xlu1 %v386_v36 }
  0x81   :  { %648 = vmax.xlane.f32.xlu2 %v483_v37 }
  0x83   :  { %v611_v40 = vpop.xlane.xlu0 %610  ;;  %v609_v41 = vpop.xlane.xlu1 %608 }
  0x84   :  { %v628_v42 = vmul.f32 0.00390625, %v611_v40  ;;  %v627_v43 = vmul.f32 0.00390625, %v609_v41  ;;  %v607_v45 = vpop.xlane.xlu2 %606 }
  0x85   :  { %v626_v48 = vmul.f32 0.00390625, %v607_v45 }
  0x86   :  { %679 = vmatpush.msra.mxu2 %v628_v42 }
  0x88   :  { %1249 = vadd.xlane.f32.xlu0 %v408_v44  ;;  %680 = vmatpush.msra.mxu2 %v627_v43 }
  0x89   :  { %646 = vmax.xlane.f32.xlu2 %v482_v46  ;;  %1316 = vmax.xlane.f32.xlu1 %v505_v47 }
  0x8a   :  { %681 = vmatpush.msra.mxu2 %v626_v48 }
  0x8b   :  { %v673_v53 = vpop.xlane.xlu0 %672  ;;  %v605_v54 = vpop.xlane.xlu1 %604 }
  0x8c   :  { %701 = vmatpush.msra.mxu3 %v673_v53  ;;  %v671_v56 = vpop.xlane.xlu2 %670  ;;  %v625_v57 = vmul.f32 0.00390625, %v605_v54 }
  0x8e   :  { %702 = vmatpush.msra.mxu3 %v671_v56  ;;  %682 = vmatpush.msra.mxu2 %v625_v57 }
  0x90   :  { %1247 = vadd.xlane.f32.xlu0 %v407_v55 }
  0x91   :  { %1245 = vadd.xlane.f32.xlu2 %v406_v58  ;;  %1314 = vmax.xlane.f32.xlu1 %v504_v59 }
  0x93   :  { %v603_v62 = vpop.xlane.xlu0 %602  ;;  %v669_v63 = vpop.xlane.xlu1 %668 }
  0x94   :  { %v624_v0 = vmul.f32 0.00390625, %v603_v62  ;;  %v601_v2 = vpop.xlane.xlu2 %600  ;;  %703 = vmatpush.msra.mxu3 %v669_v63 }
  0x95   :  { %v623_v3 = vmul.f32 0.00390625, %v601_v2 }
  0x96   :  { %683 = vmatpush.msra.mxu2 %v624_v0 }
  0x98   :  { %1312 = vmax.xlane.f32.xlu0 %v503_v1  ;;  %684 = vmatpush.msra.mxu2 %v623_v3 }
  0x99   :  { %1310 = vmax.xlane.f32.xlu2 %v502_v4  ;;  %1243 = vadd.xlane.f32.xlu1 %v405_v5 }
  0x9b   :  { %v667_v10 = vpop.xlane.xlu0 %666  ;;  %v1268_v11 = vpop.xlane.xlu1 %1267 }
  0x9c   :  { %704 = vmatpush.msra.mxu3 %v667_v10  ;;  %v599_v13 = vpop.xlane.xlu2 %598  ;;  %v1284_v14 = vmul.f32 0.00390625, %v1268_v11 }
  0x9d   :  { %v622_v15 = vmul.f32 0.00390625, %v599_v13 }
  0x9e   :  { %1334 = vmatpush.msra.mxu0 %v1284_v14 }
  0x9f   :  { %685 = vmatpush.msra.mxu2 %v622_v15 }
  0xa0   :  { %1241 = vadd.xlane.f32.xlu0 %v404_v12 }
  0xa1   :  { %1239 = vadd.xlane.f32.xlu2 %v403_v16  ;;  %1308 = vmax.xlane.f32.xlu1 %v501_v17 }
  0xa3   :  { %v665_v20 = vpop.xlane.xlu0 %664  ;;  %v1266_v21 = vpop.xlane.xlu1 %1265 }
  0xa4   :  { %705 = vmatpush.msra.mxu3 %v665_v20  ;;  %v1283_v23 = vmul.f32 0.00390625, %v1266_v21  ;;  %v1333_v24 = vpop.xlane.xlu2 %1332 }
  0xa5   :  { %1355 = vmatpush.msra.mxu1 %v1333_v24 }
  0xa6   :  { %1335 = vmatpush.msra.mxu0 %v1283_v23 }
  0xa8   :  { %1306 = vmax.xlane.f32.xlu0 %v500_v22 }
  0xa9   :  { %1304 = vmax.xlane.f32.xlu2 %v499_v25  ;;  %1237 = vadd.xlane.f32.xlu1 %v402_v26 }
  0xab   :  { %v597_v27 = vpop.xlane.xlu0 %596  ;;  %v663_v28 = vpop.xlane.xlu1 %662 }
  0xac   :  { %v621_v29 = vmul.f32 0.00390625, %v597_v27  ;;  %v1264_v31 = vpop.xlane.xlu2 %1263  ;;  %706 = vmatpush.msra.mxu3 %v663_v28 }
  0xad   :  { %v1282_v32 = vmul.f32 0.00390625, %v1264_v31 }
  0xae   :  { %686 = vmatpush.msra.mxu2 %v621_v29 }
  0xaf   :  { %1336 = vmatpush.msra.mxu0 %v1282_v32 }
  0xb0   :  { %1302 = vmax.xlane.f32.xlu0 %v498_v30 }
  0xb3   :  { %v1331_v33 = vpop.xlane.xlu0 %1330  ;;  %v595_v34 = vpop.xlane.xlu1 %594 }
  0xb4   :  { %1356 = vmatpush.msra.mxu1 %v1331_v33  ;;  %v661_v35 = vpop.xlane.xlu2 %660  ;;  %v620_v36 = vmul.f32 0.00390625, %v595_v34 }
  0xb5   :  { %707 = vmatpush.msra.mxu3 %v661_v35  ;;  %v550_v35 = vld [vmem:[%s2855_s2] sm:$0xff] }
  0xb6   :  { %687 = vmatpush.msra.mxu2 %v620_v36 }
  0xbb   :  { %v1262_v37 = vpop.xlane.xlu0 %1261  ;;  %v1329_v38 = vpop.xlane.xlu1 %1328 }
  0xbc   :  { %v1281_v39 = vmul.f32 0.00390625, %v1262_v37  ;;  %v593_v40 = vpop.xlane.xlu2 %592  ;;  %1357 = vmatpush.msra.mxu1 %v1329_v38  ;;  %v551_v38 = vld [vmem:[%s2855_s2 + $0x8] sm:$0xff] }
  0xbd   :  { %v619_v41 = vmul.f32 0.00390625, %v593_v40  ;;  %v553_v40 = vld [vmem:[%s2855_s2 + $0x18] sm:$0xff] }
  0xbe   :  { %1337 = vmatpush.msra.mxu0 %v1281_v39  ;;  %v552_v39 = vld [vmem:[%s2855_s2 + $0x10] sm:$0xff] }
  0xbf   :  { %688 = vmatpush.msra.mxu2 %v619_v41  ;;  %v554_v41 = vld [vmem:[%s2855_s2 + $0x20] sm:$0xff] }
  0xc3   :  { %v659_v42 = vpop.xlane.xlu0 %658  ;;  %v1260_v43 = vpop.xlane.xlu1 %1259 }
  0xc4   :  { %708 = vmatpush.msra.mxu3 %v659_v42  ;;  %v1280_v44 = vmul.f32 0.00390625, %v1260_v43  ;;  %v1327_v45 = vpop.xlane.xlu2 %1326 }
  0xc5   :  { %1358 = vmatpush.msra.mxu1 %v1327_v45 }
  0xc6   :  { %1338 = vmatpush.msra.mxu0 %v1280_v44 }
  0xcb   :  { %v591_v46 = vpop.xlane.xlu0 %590  ;;  %v657_v47 = vpop.xlane.xlu1 %656 }
  0xcc   :  { %v618_v48 = vmul.f32 0.00390625, %v591_v46  ;;  %v1258_v49 = vpop.xlane.xlu2 %1257  ;;  %709 = vmatpush.msra.mxu3 %v657_v47  ;;  %v555_v46 = vld [vmem:[%s2855_s2 + $0x28] sm:$0xff]  ;;  %v556_v47 = vld [vmem:[%s2855_s2 + $0x30] sm:$0xff] }
  0xcd   :  { %v1279_v50 = vmul.f32 0.00390625, %v1258_v49  ;;  %v558_v49 = vld [vmem:[%s2855_s2 + $0x40] sm:$0xff] }
  0xce   :  { %689 = vmatpush.msra.mxu2 %v618_v48  ;;  %v557_v48 = vld [vmem:[%s2855_s2 + $0x38] sm:$0xff] }
  0xcf   :  { %1339 = vmatpush.msra.mxu0 %v1279_v50  ;;  %v559_v50 = vld [vmem:[%s2855_s2 + $0x48] sm:$0xff] }
  0xd3   :  { %v1325_v51 = vpop.xlane.xlu0 %1324  ;;  %v589_v52 = vpop.xlane.xlu1 %588 }
  0xd4   :  { %1359 = vmatpush.msra.mxu1 %v1325_v51  ;;  %v655_v53 = vpop.xlane.xlu2 %654  ;;  %v617_v54 = vmul.f32 0.00390625, %v589_v52  ;;  %v560_v51 = vld [vmem:[%s2855_s2 + $0x50] sm:$0xff]  ;;  %v561_v52 = vld [vmem:[%s2855_s2 + $0x58] sm:$0xff] }
  0xd5   :  { %710 = vmatpush.msra.mxu3 %v655_v53  ;;  %v562_v53 = vld [vmem:[%s2855_s2 + $0x60] sm:$0xff] }
  0xd6   :  { %690 = vmatpush.msra.mxu2 %v617_v54  ;;  %v563_v54 = vld [vmem:[%s2855_s2 + $0x68] sm:$0xff] }
  0xdb   :  { %v1256_v55 = vpop.xlane.xlu0 %1255  ;;  %v1323_v56 = vpop.xlane.xlu1 %1322 }
  0xdc   :  { %v1278_v57 = vmul.f32 0.00390625, %v1256_v55  ;;  %v587_v58 = vpop.xlane.xlu2 %586  ;;  %1360 = vmatpush.msra.mxu1 %v1323_v56  ;;  %v564_v55 = vld [vmem:[%s2855_s2 + $0x70] sm:$0xff]  ;;  %v565_v56 = vld [vmem:[%s2855_s2 + $0x78] sm:$0xff] }
  0xdd   :  { %v616_v59 = vmul.f32 0.00390625, %v587_v58 }
  0xde   :  { %1340 = vmatpush.msra.mxu0 %v1278_v57 }
  0xdf   :  { %691 = vmatpush.msra.mxu2 %v616_v59 }
  0xe3   :  { %v653_v60 = vpop.xlane.xlu0 %652  ;;  %v1254_v61 = vpop.xlane.xlu1 %1253 }
  0xe4   :  { %711 = vmatpush.msra.mxu3 %v653_v60  ;;  %v1277_v62 = vmul.f32 0.00390625, %v1254_v61  ;;  %v1321_v63 = vpop.xlane.xlu2 %1320 }
  0xe5   :  { %1361 = vmatpush.msra.mxu1 %v1321_v63 }
  0xe6   :  { %1341 = vmatpush.msra.mxu0 %v1277_v62 }
  0xeb   :  { %v585_v0 = vpop.xlane.xlu0 %584  ;;  %v651_v1 = vpop.xlane.xlu1 %650 }
  0xec   :  { %v615_v2 = vmul.f32 0.00390625, %v585_v0  ;;  %v1252_v3 = vpop.xlane.xlu2 %1251  ;;  %712 = vmatpush.msra.mxu3 %v651_v1 }
  0xed   :  { %v1276_v4 = vmul.f32 0.00390625, %v1252_v3 }
  0xee   :  { %692 = vmatpush.msra.mxu2 %v615_v2 }
  0xef   :  { %1342 = vmatpush.msra.mxu0 %v1276_v4 }
  0xf3   :  { %v1319_v5 = vpop.xlane.xlu0 %1318  ;;  %v583_v6 = vpop.xlane.xlu1 %582 }
  0xf4   :  { %1362 = vmatpush.msra.mxu1 %v1319_v5  ;;  %v649_v7 = vpop.xlane.xlu2 %648  ;;  %v614_v8 = vmul.f32 0.00390625, %v583_v6 }
  0xf5   :  { %713 = vmatpush.msra.mxu3 %v649_v7 }
  0xf6   :  { %693 = vmatpush.msra.mxu2 %v614_v8 }
  0xf7   :  { %694 = vmatmul.f32.vlgmr.msra.gmra.mxu2 %v549_v9 }
  0xfb   :  { %v1250_v10 = vpop.xlane.xlu0 %1249 }
  0xfc   :  { %v1275_v11 = vmul.f32 0.00390625, %v1250_v10  ;;  %v647_v12 = vpop.xlane.xlu2 %646  ;;  %v1317_v13 = vpop.xlane.xlu1 %1316 }
  0xfd   :  { %714 = vmatpush.msra.mxu3 %v647_v12  ;;  %1363 = vmatpush.msra.mxu1 %v1317_v13 }
  0xfe   :  { %1343 = vmatpush.msra.mxu0 %v1275_v11  ;;  %715 = vmatmul.f32.vlgmr.msra.gmra.mxu3 %v549_v9 }
 0x103   :  { %v1248_v14 = vpop.xlane.xlu0 %1247 }
 0x104   :  { %v1274_v15 = vmul.f32 0.00390625, %v1248_v14  ;;  %v1246_v16 = vpop.xlane.xlu2 %1245  ;;  %v1315_v17 = vpop.xlane.xlu1 %1314 }
 0x105   :  { %v1273_v18 = vmul.f32 0.00390625, %v1246_v16  ;;  %1364 = vmatpush.msra.mxu1 %v1315_v17 }
 0x106   :  { %1344 = vmatpush.msra.mxu0 %v1274_v15 }
 0x108   :  { %1345 = vmatpush.msra.mxu0 %v1273_v18 }
 0x10b   :  { %v1313_v19 = vpop.xlane.xlu0 %1312 }
 0x10c   :  { %1365 = vmatpush.msra.mxu1 %v1313_v19  ;;  %v1311_v20 = vpop.xlane.xlu2 %1310  ;;  %v1244_v21 = vpop.xlane.xlu1 %1243 }
 0x10d   :  { %v1272_v22 = vmul.f32 0.00390625, %v1244_v21 }
 0x10e   :  { %1366 = vmatpush.msra.mxu1 %v1311_v20 }
 0x10f   :  { %1346 = vmatpush.msra.mxu0 %v1272_v22 }
 0x113   :  { %v1242_v23 = vpop.xlane.xlu0 %1241 }
 0x114   :  { %v1271_v24 = vmul.f32 0.00390625, %v1242_v23  ;;  %v1240_v25 = vpop.xlane.xlu2 %1239  ;;  %v1309_v26 = vpop.xlane.xlu1 %1308 }
 0x115   :  { %v1270_v27 = vmul.f32 0.00390625, %v1240_v25  ;;  %1367 = vmatpush.msra.mxu1 %v1309_v26 }
 0x116   :  { %1347 = vmatpush.msra.mxu0 %v1271_v24 }
 0x118   :  { %1348 = vmatpush.msra.mxu0 %v1270_v27 }
 0x11b   :  { %v1307_v28 = vpop.xlane.xlu0 %1306 }
 0x11c   :  { %1368 = vmatpush.msra.mxu1 %v1307_v28  ;;  %v1305_v29 = vpop.xlane.xlu2 %1304  ;;  %v1238_v30 = vpop.xlane.xlu1 %1237 }
 0x11d   :  { %v1269_v31 = vmul.f32 0.00390625, %v1238_v30 }
 0x11e   :  { %1369 = vmatpush.msra.mxu1 %v1305_v29 }
 0x11f   :  { %1349 = vmatpush.msra.mxu0 %v1269_v31 }
 0x120   :  { %1350 = vmatmul.f32.vlgmr.msra.gmra.mxu0 %v549_v9 }
 0x123   :  { %v1303_v32 = vpop.xlane.xlu0 %1302 }
 0x124   :  { %1370 = vmatpush.msra.mxu1 %v1303_v32 }
 0x125   :  { %1371 = vmatmul.f32.vlgmr.msra.gmra.mxu1 %v549_v9 }
 0x17a   :  { %v695_v33 = vpop.f32.mrf.mxu2 }
 0x17b   :  { %v698_v34 = vmax.f32 %v695_v33, 0.0 }
 0x17d   :  { %849 = vmatpush.msrb.mxu3 %v698_v34 }
 0x17e   :  { %1848 = vmatmul.msk.f32.vlgmr.msrb.gmra.mxu3 %vm720_vm0, %v550_v35 }
 0x181   :  { %v716_v36 = vpop.f32.mrf.mxu3 }
 0x182   :  { %v719_v37 = vmax.f32 %v716_v36, 0.0 }
 0x184   :  { %784 = vmatpush.msrb.mxu2 %v719_v37 }
 0x185   :  { %1832 = vmatmul.msk.f32.vlgmr.msrb.gmra.mxu2 %vm720_vm0, %v550_v35 }
 0x186   :  { %1849 = vmatmul.msk.f32.gmra.mxu3 %vm720_vm0, %v551_v38 }
 0x18d   :  { %1833 = vmatmul.msk.f32.gmra.mxu2 %vm720_vm0, %v551_v38 }
 0x18e   :  { %1850 = vmatmul.msk.f32.gmra.mxu3 %vm720_vm0, %v552_v39 }
 0x195   :  { %1834 = vmatmul.msk.f32.gmra.mxu2 %vm720_vm0, %v552_v39 }
 0x196   :  { %1851 = vmatmul.msk.f32.gmra.mxu3 %vm720_vm0, %v553_v40 }
 0x19d   :  { %v1351_v42 = vpop.f32.mrf.mxu0  ;;  %1835 = vmatmul.msk.f32.gmra.mxu2 %vm720_vm0, %v553_v40 }
 0x19e   :  { %v1354_v43 = vmax.f32 %v1351_v42, 0.0  ;;  %1852 = vmatmul.msk.f32.gmra.mxu3 %vm720_vm0, %v554_v41 }
 0x1a0   :  { %1456 = vmatpush.msrb.mxu1 %v1354_v43 }
 0x1a1   :  { %1896 = vmatmul.msk.f32.vlgmr.msrb.gmra.mxu1 %vm720_vm0, %v550_v35 }
 0x1a2   :  { %v1372_v44 = vpop.f32.mrf.mxu1 }
 0x1a3   :  { %v1375_v45 = vmax.f32 %v1372_v44, 0.0 }
 0x1a5   :  { %1391 = vmatpush.msrb.mxu0 %v1375_v45  ;;  %1836 = vmatmul.msk.f32.gmra.mxu2 %vm720_vm0, %v554_v41 }
 0x1a6   :  { %1880 = vmatmul.msk.f32.vlgmr.msrb.gmra.mxu0 %vm720_vm0, %v550_v35  ;;  %1853 = vmatmul.msk.f32.gmra.mxu3 %vm720_vm0, %v555_v46 }
 0x1a9   :  { %1897 = vmatmul.msk.f32.gmra.mxu1 %vm720_vm0, %v551_v38 }
 0x1ad   :  { %1837 = vmatmul.msk.f32.gmra.mxu2 %vm720_vm0, %v555_v46 }
 0x1ae   :  { %1881 = vmatmul.msk.f32.gmra.mxu0 %vm720_vm0, %v551_v38  ;;  %1854 = vmatmul.msk.f32.gmra.mxu3 %vm720_vm0, %v556_v47 }
 0x1b1   :  { %1898 = vmatmul.msk.f32.gmra.mxu1 %vm720_vm0, %v552_v39 }
 0x1b5   :  { %1838 = vmatmul.msk.f32.gmra.mxu2 %vm720_vm0, %v556_v47 }
 0x1b6   :  { %1882 = vmatmul.msk.f32.gmra.mxu0 %vm720_vm0, %v552_v39  ;;  %1855 = vmatmul.msk.f32.gmra.mxu3 %vm720_vm0, %v557_v48 }
 0x1b9   :  { %1899 = vmatmul.msk.f32.gmra.mxu1 %vm720_vm0, %v553_v40 }
 0x1bd   :  { %1839 = vmatmul.msk.f32.gmra.mxu2 %vm720_vm0, %v557_v48 }
 0x1be   :  { %1883 = vmatmul.msk.f32.gmra.mxu0 %vm720_vm0, %v553_v40  ;;  %1856 = vmatmul.msk.f32.gmra.mxu3 %vm720_vm0, %v558_v49 }
 0x1c1   :  { %1900 = vmatmul.msk.f32.gmra.mxu1 %vm720_vm0, %v554_v41 }
 0x1c5   :  { %1840 = vmatmul.msk.f32.gmra.mxu2 %vm720_vm0, %v558_v49 }
 0x1c6   :  { %1884 = vmatmul.msk.f32.gmra.mxu0 %vm720_vm0, %v554_v41  ;;  %1857 = vmatmul.msk.f32.gmra.mxu3 %vm720_vm0, %v559_v50 }
 0x1c9   :  { %1901 = vmatmul.msk.f32.gmra.mxu1 %vm720_vm0, %v555_v46 }
 0x1cd   :  { %1841 = vmatmul.msk.f32.gmra.mxu2 %vm720_vm0, %v559_v50 }
 0x1ce   :  { %1885 = vmatmul.msk.f32.gmra.mxu0 %vm720_vm0, %v555_v46  ;;  %1858 = vmatmul.msk.f32.gmra.mxu3 %vm720_vm0, %v560_v51 }
 0x1d1   :  { %1902 = vmatmul.msk.f32.gmra.mxu1 %vm720_vm0, %v556_v47 }
 0x1d5   :  { %1842 = vmatmul.msk.f32.gmra.mxu2 %vm720_vm0, %v560_v51 }
 0x1d6   :  { %1886 = vmatmul.msk.f32.gmra.mxu0 %vm720_vm0, %v556_v47  ;;  %1859 = vmatmul.msk.f32.gmra.mxu3 %vm720_vm0, %v561_v52 }
 0x1d9   :  { %1903 = vmatmul.msk.f32.gmra.mxu1 %vm720_vm0, %v557_v48 }
 0x1dd   :  { %1843 = vmatmul.msk.f32.gmra.mxu2 %vm720_vm0, %v561_v52 }
 0x1de   :  { %1887 = vmatmul.msk.f32.gmra.mxu0 %vm720_vm0, %v557_v48  ;;  %1860 = vmatmul.msk.f32.gmra.mxu3 %vm720_vm0, %v562_v53 }
 0x1e1   :  { %1904 = vmatmul.msk.f32.gmra.mxu1 %vm720_vm0, %v558_v49 }
 0x1e5   :  { %1844 = vmatmul.msk.f32.gmra.mxu2 %vm720_vm0, %v562_v53 }
 0x1e6   :  { %1888 = vmatmul.msk.f32.gmra.mxu0 %vm720_vm0, %v558_v49  ;;  %1861 = vmatmul.msk.f32.gmra.mxu3 %vm720_vm0, %v563_v54 }
 0x1e9   :  { %1905 = vmatmul.msk.f32.gmra.mxu1 %vm720_vm0, %v559_v50 }
 0x1ed   :  { %1845 = vmatmul.msk.f32.gmra.mxu2 %vm720_vm0, %v563_v54 }
 0x1ee   :  { %1889 = vmatmul.msk.f32.gmra.mxu0 %vm720_vm0, %v559_v50  ;;  %1862 = vmatmul.msk.f32.gmra.mxu3 %vm720_vm0, %v564_v55 }
 0x1f1   :  { %1906 = vmatmul.msk.f32.gmra.mxu1 %vm720_vm0, %v560_v51 }
 0x1f5   :  { %1846 = vmatmul.msk.f32.gmra.mxu2 %vm720_vm0, %v564_v55 }
 0x1f6   :  { %1890 = vmatmul.msk.f32.gmra.mxu0 %vm720_vm0, %v560_v51  ;;  %1863 = vmatmul.msk.f32.gmra.mxu3 %vm720_vm0, %v565_v56 }
 0x1f9   :  { %1907 = vmatmul.msk.f32.gmra.mxu1 %vm720_vm0, %v561_v52 }
 0x1fd   :  { %1847 = vmatmul.msk.f32.gmra.mxu2 %vm720_vm0, %v565_v56 }
 0x1fe   :  { %1891 = vmatmul.msk.f32.gmra.mxu0 %vm720_vm0, %v561_v52 }
 0x201   :  { %1908 = vmatmul.msk.f32.gmra.mxu1 %vm720_vm0, %v562_v53  ;;  %v851_v57 = vpop.f32.mrf.mxu3 }
 0x206   :  { %1892 = vmatmul.msk.f32.gmra.mxu0 %vm720_vm0, %v562_v53 }
 0x208   :  { %v786_v58 = vpop.f32.mrf.mxu2 }
 0x209   :  { %1909 = vmatmul.msk.f32.gmra.mxu1 %vm720_vm0, %v563_v54  ;;  %v852_v59 = vadd.f32 %v851_v57, %v786_v58  ;;  %v854_v60 = vpop.f32.mrf.mxu3 }
 0x20b   :  { %v1864_v61 = vmul.f32 -1.442695, %v852_v59 }
 0x20d   :  { %1947 = vpow2.f32 %v1864_v61 }
 0x20e   :  { %1893 = vmatmul.msk.f32.gmra.mxu0 %vm720_vm0, %v563_v54 }
 0x210   :  { %v789_v62 = vpop.f32.mrf.mxu2 }
 0x211   :  { %1910 = vmatmul.msk.f32.gmra.mxu1 %vm720_vm0, %v564_v55  ;;  %v855_v63 = vadd.f32 %v854_v60, %v789_v62  ;;  %v857_v0 = vpop.f32.mrf.mxu3 }
 0x213   :  { %v1948_v1 = vpop.eup %1947  ;;  %v1865_v2 = vmul.f32 -1.442695, %v855_v63 }
 0x214   :  { %v947_v3 = vadd.f32 1.0, %v1948_v1 }
 0x215   :  { %1949 = vpow2.f32 %v1865_v2 }
 0x216   :  { %1894 = vmatmul.msk.f32.gmra.mxu0 %vm720_vm0, %v564_v55  ;;  %1951 = vrcp.f32 %v947_v3  ;;  %v974_v12 = vand.u32 2147483648, %v947_v3  ;;  %vm968_vm1 = vweird.f32 %v947_v3  ;;  %v972_v15 = vand.u32 2147483647, %v947_v3 }
 0x218   :  { %v792_v4 = vpop.f32.mrf.mxu2  ;;  %v975_v20 = vor.u32 1.1754944e-38, %v974_v12  ;;  %vm973_vm4 = vcmp.eq.f32.partialorder %v972_v15, 8.507059e+37 }
 0x219   :  { %1911 = vmatmul.msk.f32.gmra.mxu1 %vm720_vm0, %v565_v56  ;;  %v858_v5 = vadd.f32 %v857_v0, %v792_v4  ;;  %v860_v6 = vpop.f32.mrf.mxu3 }
 0x21b   :  { %v1950_v7 = vpop.eup %1949  ;;  %v1866_v8 = vmul.f32 -1.442695, %v858_v5 }
 0x21c   :  { %v1952_v9 = vpop.eup %1951  ;;  %v948_v10 = vadd.f32 1.0, %v1950_v7 }
 0x21d   :  { %v964_v11 = vmul.f32 %v1952_v9, %v947_v3  ;;  %1953 = vpow2.f32 %v1866_v8  ;;  %vm969_vm2 = vweird.f32 %v1952_v9 }
 0x21e   :  { %1895 = vmatmul.msk.f32.gmra.mxu0 %vm720_vm0, %v565_v56  ;;  %v1458_v13 = vpop.f32.mrf.mxu1  ;;  %1955 = vrcp.f32 %v948_v10  ;;  %vm970_vm3 = vmor %vm968_vm1, %vm969_vm2  ;;  %v989_v32 = vand.u32 2147483648, %v948_v10  ;;  %vm983_vm6 = vweird.f32 %v948_v10  ;;  %v987_v35 = vand.u32 2147483647, %v948_v10 }
 0x21f   :  { %v965_v14 = vsub.f32 1.0, %v964_v11 }
 0x220   :  { %v795_v16 = vpop.f32.mrf.mxu2  ;;  %v990_v40 = vor.u32 1.1754944e-38, %v989_v32  ;;  %vm988_vm9 = vcmp.eq.f32.partialorder %v987_v35, 8.507059e+37 }
 0x221   :  { %v966_v17 = vmul.f32 %v1952_v9, %v965_v14  ;;  %v861_v18 = vadd.f32 %v860_v6, %v795_v16  ;;  %v863_v19 = vpop.f32.mrf.mxu3 }
 0x223   :  { %v1954_v21 = vpop.eup %1953  ;;  %v967_v22 = vadd.f32 %v1952_v9, %v966_v17  ;;  %v1393_v23 = vpop.f32.mrf.mxu0  ;;  %v1867_v24 = vmul.f32 -1.442695, %v861_v18 }
 0x224   :  { %v1956_v25 = vpop.eup %1955  ;;  %v1459_v26 = vadd.f32 %v1458_v13, %v1393_v23  ;;  %v949_v27 = vadd.f32 1.0, %v1954_v21 }
 0x225   :  { %v971_v28 = vsel %vm970_vm3, %v1952_v9, %v967_v22  ;;  %v979_v29 = vmul.f32 %v1956_v25, %v948_v10  ;;  %1957 = vpow2.f32 %v1867_v24  ;;  %vm984_vm7 = vweird.f32 %v1956_v25 }
 0x226   :  { %v976_v30 = vsel %vm973_vm4, %v975_v20, %v971_v28  ;;  %v1912_v31 = vmul.f32 -1.442695, %v1459_v26  ;;  %v1461_v33 = vpop.f32.mrf.mxu1  ;;  %1959 = vrcp.f32 %v949_v27  ;;  %vm985_vm8 = vmor %vm983_vm6, %vm984_vm7  ;;  %v1004_v56 = vand.u32 2147483648, %v949_v27 }
 0x227   :  { %1204 = vst.msk [vmem:[%s2856_s3] sm:$0xff] %vm1203_vm5, %v976_v30  ;;  %v980_v34 = vsub.f32 1.0, %v979_v29  ;;  %vm998_vm10 = vweird.f32 %v949_v27  ;;  %v1002_v57 = vand.u32 2147483647, %v949_v27 }
 0x228   :  { %1961 = vpow2.f32 %v1912_v31  ;;  %v798_v36 = vpop.f32.mrf.mxu2  ;;  %v1005_v63 = vor.u32 1.1754944e-38, %v1004_v56 }
 0x229   :  { %v981_v37 = vmul.f32 %v1956_v25, %v980_v34  ;;  %v864_v38 = vadd.f32 %v863_v19, %v798_v36  ;;  %v866_v39 = vpop.f32.mrf.mxu3  ;;  %vm1003_vm13 = vcmp.eq.f32.partialorder %v1002_v57, 8.507059e+37 }
 0x22b   :  { %v1958_v41 = vpop.eup %1957  ;;  %v982_v42 = vadd.f32 %v1956_v25, %v981_v37  ;;  %v1396_v43 = vpop.f32.mrf.mxu0  ;;  %v1868_v44 = vmul.f32 -1.442695, %v864_v38 }
 0x22c   :  { %v1960_v45 = vpop.eup %1959  ;;  %v1462_v46 = vadd.f32 %v1461_v33, %v1396_v43  ;;  %v950_v47 = vadd.f32 1.0, %v1958_v41 }
 0x22d   :  { %v986_v48 = vsel %vm985_vm8, %v1956_v25, %v982_v42  ;;  %v994_v49 = vmul.f32 %v1960_v45, %v949_v27  ;;  %1963 = vpow2.f32 %v1868_v44  ;;  %vm999_vm11 = vweird.f32 %v1960_v45 }
 0x22e   :  { %v1962_v50 = vpop.eup %1961  ;;  %v991_v51 = vsel %vm988_vm9, %v990_v40, %v986_v48  ;;  %v1913_v52 = vmul.f32 -1.442695, %v1462_v46  ;;  %v1464_v53 = vpop.f32.mrf.mxu1  ;;  %1965 = vrcp.f32 %v950_v47  ;;  %vm2253_vm12 = vmor %vm998_vm10, %vm999_vm11  ;;  %v1017_v8 = vand.u32 2147483647, %v950_v47 }
 0x22f   :  { %v2246_v54 = vadd.f32 1.0, %v1962_v50  ;;  %1205 = vst.msk [vmem:[%s2856_s3 + $0x8] sm:$0xff] %vm1203_vm5, %v991_v51  ;;  %v995_v55 = vsub.f32 1.0, %v994_v49  ;;  %v1019_v9 = vand.u32 2147483648, %v950_v47  ;;  %vm1013_vm14 = vweird.f32 %v950_v47 }
 0x230   :  { %1967 = vpow2.f32 %v1913_v52  ;;  %v801_v58 = vpop.f32.mrf.mxu2  ;;  %vm2275_vm1 = vcmp.eq.f32.partialorder %v1017_v8, 8.507059e+37 }
 0x231   :  { %1969 = vrcp.f32 %v2246_v54  ;;  %v869_v59 = vpop.f32.mrf.mxu3  ;;  %v996_v60 = vmul.f32 %v1960_v45, %v995_v55  ;;  %v867_v1 = vadd.f32 %v866_v39, %v801_v58  ;;  %v1579_v6 = vand.u32 2147483647, %v2246_v54 }
 0x232   :  { %v1581_v11 = vand.u32 2147483648, %v2246_v54  ;;  %vm1575_vm0 = vweird.f32 %v2246_v54  ;;  %v1020_v26 = vor.u32 1.1754944e-38, %v1019_v9 }
 0x233   :  { %v1964_v61 = vpop.eup %1963  ;;  %v1399_v0 = vpop.f32.mrf.mxu0  ;;  %v997_v3 = vadd.f32 %v1960_v45, %v996_v60  ;;  %v1869_v19 = vmul.f32 -1.442695, %v867_v1  ;;  %vm2279_vm2 = vcmp.eq.f32.partialorder %v1579_v6, 8.507059e+37 }
 0x234   :  { %v1966_v2 = vpop.eup %1965  ;;  %v1465_v4 = vadd.f32 %v1464_v53, %v1399_v0  ;;  %v2257_v5 = vadd.f32 1.0, %v1964_v61  ;;  %v1582_v28 = vor.u32 1.1754944e-38, %v1581_v11 }
 0x235   :  { %v1009_v7 = vmul.f32 %v1966_v2, %v950_v47  ;;  %v1001_v12 = vsel %vm2253_vm12, %v1960_v45, %v997_v3  ;;  %vm1014_vm15 = vweird.f32 %v1966_v2 }
 0x236   :  { %v1968_v10 = vpop.eup %1967  ;;  %v1914_v13 = vmul.f32 -1.442695, %v1465_v4  ;;  %v1467_v14 = vpop.f32.mrf.mxu1  ;;  %1971 = vrcp.f32 %v2257_v5  ;;  %v1006_v17 = vsel %vm1003_vm13, %v1005_v63, %v1001_v12  ;;  %vm2283_vm3 = vmor %vm1013_vm14, %vm1014_vm15  ;;  %vm1028_vm6 = vweird.f32 %v2257_v5 }
 0x237   :  { %v1970_v15 = vpop.eup %1969  ;;  %v2264_v16 = vadd.f32 1.0, %v1968_v10  ;;  %v1010_v18 = vsub.f32 1.0, %v1009_v7  ;;  %1206 = vst.msk [vmem:[%s2856_s3 + $0x10] sm:$0xff] %vm1203_vm5, %v1006_v17  ;;  %v1032_v37 = vand.u32 2147483647, %v2257_v5  ;;  %v1034_v43 = vand.u32 2147483648, %v2257_v5 }
 0x238   :  { %v1571_v20 = vmul.f32 %v1970_v15, %v2246_v54  ;;  %1973 = vpow2.f32 %v1914_v13  ;;  %v804_v21 = vpop.f32.mrf.mxu2  ;;  %vm1576_vm4 = vweird.f32 %v1970_v15 }
 0x239   :  { %1975 = vrcp.f32 %v2264_v16  ;;  %v2273_v22 = vpop.f32.mrf.mxu3  ;;  %v1011_v24 = vmul.f32 %v1966_v2, %v1010_v18  ;;  %v870_v31 = vadd.f32 %v869_v59, %v804_v21  ;;  %vm1577_vm7 = vmor %vm1575_vm0, %vm1576_vm4  ;;  %v1594_v54 = vand.u32 2147483647, %v2264_v16 }
 0x23a   :  { %v1572_v23 = vsub.f32 1.0, %v1571_v20  ;;  %1977 = vpow2.f32 %v1869_v19  ;;  %v1596_v59 = vand.u32 2147483648, %v2264_v16  ;;  %vm2323_vm10 = vcmp.eq.f32.partialorder %v1032_v37, 8.507059e+37 }
 0x23b   :  { %v1402_v30 = vpop.f32.mrf.mxu0  ;;  %v1012_v34 = vadd.f32 %v1966_v2, %v1011_v24  ;;  %v1870_v38 = vmul.f32 -1.442695, %v870_v31  ;;  %v1035_v62 = vor.u32 1.1754944e-38, %v1034_v43  ;;  %vm1590_vm12 = vweird.f32 %v2264_v16 }
 0x23c   :  { %v1972_v32 = vpop.eup %1971  ;;  %v1573_v33 = vmul.f32 %v1970_v15, %v1572_v23  ;;  %v1468_v35 = vadd.f32 %v1467_v14, %v1402_v30  ;;  %vm2328_vm13 = vcmp.eq.f32.partialorder %v1594_v54, 8.507059e+37  ;;  %v1597_v12 = vor.u32 1.1754944e-38, %v1596_v59 }
 0x23d   :  { %v1024_v36 = vmul.f32 %v1972_v32, %v2257_v5  ;;  %v1016_v41 = vsel %vm2283_vm3, %v1966_v2, %v1012_v34  ;;  %1979 = vpow2.f32 %v1870_v38  ;;  %vm1029_vm8 = vweird.f32 %v1972_v32 }
 0x23e   :  { %v1974_v39 = vpop.eup %1973  ;;  %v1574_v40 = vadd.f32 %v1970_v15, %v1573_v33  ;;  %v1915_v42 = vmul.f32 -1.442695, %v1468_v35  ;;  %v1470_v44 = vpop.f32.mrf.mxu1  ;;  %v1021_v47 = vsel %vm2275_vm1, %v1020_v26, %v1016_v41  ;;  %vm2319_vm9 = vmor %vm1028_vm6, %vm1029_vm8 }
 0x23f   :  { %v1976_v45 = vpop.eup %1975  ;;  %v2295_v46 = vadd.f32 1.0, %v1974_v39  ;;  %v1025_v48 = vsub.f32 1.0, %v1024_v36  ;;  %1207 = vst.msk [vmem:[%s2856_s3 + $0x18] sm:$0xff] %vm1203_vm5, %v1021_v47 }
 0x240   :  { %v1578_v49 = vsel %vm1577_vm7, %v1970_v15, %v1574_v40  ;;  %v1586_v50 = vmul.f32 %v1976_v45, %v2264_v16  ;;  %1981 = vpow2.f32 %v1915_v42  ;;  %v807_v51 = vpop.f32.mrf.mxu2  ;;  %v1978_v52 = vpop.eup %1977  ;;  %vm1591_vm11 = vweird.f32 %v1976_v45 }
 0x241   :  { %v1583_v53 = vsel %vm2279_vm2, %v1582_v28, %v1578_v49  ;;  %1983 = vrcp.f32 %v2295_v46  ;;  %v2308_v55 = vpop.f32.mrf.mxu3  ;;  %v1026_v57 = vmul.f32 %v1972_v32, %v1025_v48  ;;  %v2314_v58 = vadd.f32 1.0, %v1978_v52  ;;  %vm1592_vm14 = vmor %vm1590_vm12, %vm1591_vm11 }
 0x242   :  { %1928 = vst.msk [vmem:[%s2856_s3 + $0x80] sm:$0xff] %vm1203_vm5, %v1583_v53  ;;  %v1587_v56 = vsub.f32 1.0, %v1586_v50  ;;  %v873_v15 = vadd.f32 %v2273_v22, %v807_v51  ;;  %v1609_v18 = vand.u32 2147483647, %v2295_v46  ;;  %v1611_v21 = vand.u32 2147483648, %v2295_v46 }
 0x243   :  { %v1405_v63 = vpop.f32.mrf.mxu0  ;;  %v1027_v1 = vadd.f32 %v1972_v32, %v1026_v57  ;;  %v1980_v3 = vpop.eup %1979  ;;  %1985 = vrcp.f32 %v2314_v58  ;;  %v1047_v24 = vand.u32 2147483647, %v2314_v58  ;;  %vm1605_vm15 = vweird.f32 %v2295_v46 }
 0x244   :  { %v1588_v0 = vmul.f32 %v1976_v45, %v1587_v56  ;;  %v1471_v2 = vadd.f32 %v1470_v44, %v1405_v63  ;;  %v2335_v10 = vadd.f32 1.0, %v1980_v3  ;;  %v1049_v26 = vand.u32 2147483648, %v2314_v58 }
 0x245   :  { %v1031_v7 = vsel %vm2319_vm9, %v1972_v32, %v1027_v1  ;;  %v1871_v28 = vmul.f32 -1.442695, %v873_v15  ;;  %vm2362_vm1 = vcmp.eq.f32.partialorder %v1609_v18, 8.507059e+37  ;;  %v1612_v32 = vor.u32 1.1754944e-38, %v1611_v21 }
 0x246   :  { %v1982_v5 = vpop.eup %1981  ;;  %v1589_v6 = vadd.f32 %v1976_v45, %v1588_v0  ;;  %v1916_v8 = vmul.f32 -1.442695, %v1471_v2  ;;  %v1473_v9 = vpop.f32.mrf.mxu1  ;;  %v1036_v14 = vsel %vm2323_vm10, %v1035_v62, %v1031_v7  ;;  %vm1043_vm2 = vweird.f32 %v2314_v58 }
 0x247   :  { %v1984_v11 = vpop.eup %1983  ;;  %v2337_v13 = vadd.f32 1.0, %v1982_v5  ;;  %1208 = vst.msk [vmem:[%s2856_s3 + $0x20] sm:$0xff] %vm1203_vm5, %v1036_v14  ;;  %vm2368_vm4 = vcmp.eq.f32.partialorder %v1047_v24, 8.507059e+37  ;;  %v1050_v41 = vor.u32 1.1754944e-38, %v1049_v26  ;;  %vm1058_vm9 = vweird.f32 %v2335_v10 }
 0x248   :  { %v1593_v16 = vsel %vm1592_vm14, %v1976_v45, %v1589_v6  ;;  %v1601_v17 = vmul.f32 %v1984_v11, %v2295_v46  ;;  %1987 = vpow2.f32 %v1916_v8  ;;  %v810_v19 = vpop.f32.mrf.mxu2  ;;  %vm1606_vm0 = vweird.f32 %v1984_v11 }
 0x249   :  { %v1598_v20 = vsel %vm2328_vm13, %v1597_v12, %v1593_v16  ;;  %1989 = vrcp.f32 %v2337_v13  ;;  %v2352_v22 = vpop.f32.mrf.mxu3  ;;  %v1986_v25 = vpop.eup %1985  ;;  %vm1607_vm6 = vmor %vm1605_vm15, %vm1606_vm0  ;;  %v876_v43 = vadd.f32 %v2308_v55, %v810_v19  ;;  %vm1620_vm7 = vweird.f32 %v2337_v13 }
 0x24a   :  { %1929 = vst.msk [vmem:[%s2856_s3 + $0x88] sm:$0xff] %vm1203_vm5, %v1598_v20  ;;  %v1602_v23 = vsub.f32 1.0, %v1601_v17  ;;  %1991 = vrcp.f32 %v2335_v10  ;;  %v1039_v31 = vmul.f32 %v1986_v25, %v2314_v58  ;;  %vm1044_vm3 = vweird.f32 %v1986_v25 }
 0x24b   :  { %v1408_v27 = vpop.f32.mrf.mxu0  ;;  %1993 = vpow2.f32 %v1871_v28  ;;  %v1624_v46 = vand.u32 2147483647, %v2337_v13  ;;  %v1626_v51 = vand.u32 2147483648, %v2337_v13  ;;  %vm2389_vm8 = vmor %vm1043_vm2, %vm1044_vm3  ;;  %v1062_v58 = vand.u32 2147483647, %v2335_v10 }
 0x24c   :  { %v1603_v29 = vmul.f32 %v1984_v11, %v1602_v23  ;;  %v1474_v33 = vadd.f32 %v1473_v9, %v1408_v27  ;;  %v1040_v36 = vsub.f32 1.0, %v1039_v31  ;;  %v1064_v59 = vand.u32 2147483648, %v2335_v10 }
 0x24d   :  { %v1872_v61 = vmul.f32 -1.442695, %v876_v43  ;;  %v1627_v5 = vor.u32 1.1754944e-38, %v1626_v51  ;;  %vm1625_vm13 = vcmp.eq.f32.partialorder %v1624_v46, 8.507059e+37  ;;  %vm1063_vm0 = vcmp.eq.f32.partialorder %v1062_v58, 8.507059e+37 }
 0x24e   :  { %v1988_v34 = vpop.eup %1987  ;;  %v1604_v35 = vadd.f32 %v1984_v11, %v1603_v29  ;;  %v1476_v38 = vpop.f32.mrf.mxu1  ;;  %v1917_v42 = vmul.f32 -1.442695, %v1474_v33  ;;  %v1041_v48 = vmul.f32 %v1986_v25, %v1040_v36  ;;  %v1065_v21 = vor.u32 1.1754944e-38, %v1064_v59 }
 0x24f   :  { %v1990_v39 = vpop.eup %1989  ;;  %v2374_v40 = vadd.f32 1.0, %v1988_v34 }
 0x250   :  { %v2377_v44 = vpop.eup %1991  ;;  %v1608_v45 = vsel %vm1607_vm6, %v1984_v11, %v1604_v35  ;;  %v1616_v47 = vmul.f32 %v1990_v39, %v2337_v13  ;;  %v813_v49 = vpop.f32.mrf.mxu2  ;;  %v1042_v55 = vadd.f32 %v1986_v25, %v1041_v48  ;;  %vm1621_vm10 = vweird.f32 %v1990_v39 }
 0x251   :  { %v1613_v50 = vsel %vm2362_vm1, %v1612_v32, %v1608_v45  ;;  %1995 = vrcp.f32 %v2374_v40  ;;  %v2393_v53 = vpop.f32.mrf.mxu3  ;;  %v1994_v56 = vpop.eup %1993  ;;  %v1054_v57 = vmul.f32 %v2377_v44, %v2335_v10  ;;  %vm1059_vm11 = vweird.f32 %v2377_v44  ;;  %vm1622_vm12 = vmor %vm1620_vm7, %vm1621_vm10 }
 0x252   :  { %1930 = vst.msk [vmem:[%s2856_s3 + $0x90] sm:$0xff] %vm1203_vm5, %v1613_v50  ;;  %v1617_v54 = vsub.f32 1.0, %v1616_v47  ;;  %1997 = vpow2.f32 %v1917_v42  ;;  %v1046_v63 = vsel %vm2389_vm8, %v1986_v25, %v1042_v55  ;;  %v2408_v3 = vadd.f32 1.0, %v1994_v56  ;;  %vm2429_vm14 = vmor %vm1058_vm9, %vm1059_vm11 }
 0x253   :  { %v1411_v60 = vpop.f32.mrf.mxu0  ;;  %v1051_v1 = vsel %vm2368_vm4, %v1050_v41, %v1046_v63  ;;  %v1055_v2 = vsub.f32 1.0, %v1054_v57  ;;  %1999 = vpow2.f32 %v1872_v61  ;;  %v1639_v9 = vand.u32 2147483647, %v2374_v40 }
 0x254   :  { %v1618_v62 = vmul.f32 %v1990_v39, %v1617_v54  ;;  %v1477_v0 = vadd.f32 %v1476_v38, %v1411_v60  ;;  %1209 = vst.msk [vmem:[%s2856_s3 + $0x28] sm:$0xff] %vm1203_vm5, %v1051_v1  ;;  %v1641_v11 = vand.u32 2147483648, %v2374_v40  ;;  %2001 = vrcp.f32 %v2408_v3 }
 0x255   :  { %v1056_v12 = vmul.f32 %v2377_v44, %v1055_v2  ;;  %vm1635_vm15 = vweird.f32 %v2374_v40  ;;  %v879_v25 = vadd.f32 %v2352_v22, %v813_v49  ;;  %vm2441_vm1 = vcmp.eq.f32.partialorder %v1639_v9, 8.507059e+37 }
 0x256   :  { %v1619_v4 = vadd.f32 %v1990_v39, %v1618_v62  ;;  %v1918_v6 = vmul.f32 -1.442695, %v1477_v0  ;;  %v1479_v7 = vpop.f32.mrf.mxu1  ;;  %v1642_v27 = vor.u32 1.1754944e-38, %v1641_v11  ;;  %vm1073_vm2 = vweird.f32 %v2408_v3 }
 0x257   :  { %v1996_v8 = vpop.eup %1995  ;;  %v1057_v13 = vadd.f32 %v2377_v44, %v1056_v12  ;;  %v1077_v33 = vand.u32 2147483647, %v2408_v3  ;;  %v1079_v34 = vand.u32 2147483648, %v2408_v3  ;;  %v1873_v42 = vmul.f32 -1.442695, %v879_v25 }
 0x258   :  { %v1998_v14 = vpop.eup %1997  ;;  %v1623_v15 = vsel %vm1622_vm12, %v1990_v39, %v1619_v4  ;;  %v1631_v16 = vmul.f32 %v1996_v8, %v2374_v40  ;;  %2003 = vpow2.f32 %v1918_v6  ;;  %v816_v17 = vpop.f32.mrf.mxu2  ;;  %vm1636_vm3 = vweird.f32 %v1996_v8 }
 0x259   :  { %v1628_v18 = vsel %vm1625_vm13, %v1627_v5, %v1623_v15  ;;  %v2422_v19 = vadd.f32 1.0, %v1998_v14  ;;  %v2433_v23 = vpop.f32.mrf.mxu3  ;;  %v2000_v26 = vpop.eup %1999  ;;  %v1061_v30 = vsel %vm2429_vm14, %v2377_v44, %v1057_v13  ;;  %vm1637_vm4 = vmor %vm1635_vm15, %vm1636_vm3  ;;  %v882_v40 = vadd.f32 %v2393_v53, %v816_v17 }
 0x25a   :  { %1931 = vst.msk [vmem:[%s2856_s3 + $0x98] sm:$0xff] %vm1203_vm5, %v1628_v18  ;;  %v1632_v24 = vsub.f32 1.0, %v1631_v16  ;;  %v2002_v32 = vpop.eup %2001  ;;  %v1066_v22 = vsel %vm1063_vm0, %v1065_v21, %v1061_v30  ;;  %v2452_v35 = vadd.f32 1.0, %v2000_v26  ;;  %vm2479_vm8 = vcmp.eq.f32.partialorder %v1077_v33, 8.507059e+37 }
 0x25b   :  { %2005 = vrcp.f32 %v2422_v19  ;;  %v1414_v28 = vpop.f32.mrf.mxu0  ;;  %1210 = vst.msk [vmem:[%s2856_s3 + $0x30] sm:$0xff] %vm1203_vm5, %v1066_v22  ;;  %v1069_v38 = vmul.f32 %v2002_v32, %v2408_v3  ;;  %v1654_v43 = vand.u32 2147483647, %v2422_v19  ;;  %v1656_v44 = vand.u32 2147483648, %v2422_v19 }
 0x25c   :  { %v1633_v29 = vmul.f32 %v1996_v8, %v1632_v24  ;;  %v1480_v31 = vadd.f32 %v1479_v7, %v1414_v28  ;;  %2007 = vrcp.f32 %v2452_v35  ;;  %vm1074_vm6 = vweird.f32 %v2002_v32 }
 0x25d   :  { %v1070_v48 = vsub.f32 1.0, %v1069_v38  ;;  %vm1650_vm7 = vweird.f32 %v2422_v19  ;;  %vm2483_vm9 = vcmp.eq.f32.partialorder %v1654_v43, 8.507059e+37  ;;  %v1657_v53 = vor.u32 1.1754944e-38, %v1656_v44  ;;  %vm2490_vm10 = vmor %vm1073_vm2, %vm1074_vm6 }
 0x25e   :  { %v2004_v36 = vpop.eup %2003  ;;  %v1634_v37 = vadd.f32 %v1996_v8, %v1633_v29  ;;  %v1919_v39 = vmul.f32 -1.442695, %v1480_v31  ;;  %v1482_v41 = vpop.f32.mrf.mxu1  ;;  %v1080_v58 = vor.u32 1.1754944e-38, %v1079_v34  ;;  %vm1088_vm11 = vweird.f32 %v2452_v35 }
 0x25f   :  { %v2464_v45 = vadd.f32 1.0, %v2004_v36  ;;  %v1071_v54 = vmul.f32 %v2002_v32, %v1070_v48  ;;  %v1092_v0 = vand.u32 2147483647, %v2452_v35  ;;  %v1094_v1 = vand.u32 2147483648, %v2452_v35 }
 0x260   :  { %v1638_v47 = vsel %vm1637_vm4, %v1996_v8, %v1634_v37  ;;  %2009 = vpow2.f32 %v1919_v39  ;;  %v819_v49 = vpop.f32.mrf.mxu2  ;;  %v1874_v2 = vmul.f32 -1.442695, %v882_v40 }
 0x261   :  { %v2006_v50 = vpop.eup %2005  ;;  %v1643_v46 = vsel %vm2441_vm1, %v1642_v27, %v1638_v47  ;;  %2011 = vrcp.f32 %v2464_v45  ;;  %v2471_v51 = vpop.f32.mrf.mxu3  ;;  %v1072_v61 = vadd.f32 %v2002_v32, %v1071_v54  ;;  %vm1665_vm13 = vweird.f32 %v2464_v45 }
 0x262   :  { %1932 = vst.msk [vmem:[%s2856_s3 + $0xa0] sm:$0xff] %vm1203_vm5, %v1643_v46  ;;  %v1646_v52 = vmul.f32 %v2006_v50, %v2422_v19  ;;  %2013 = vpow2.f32 %v1873_v42  ;;  %v2008_v63 = vpop.eup %2007  ;;  %vm1651_vm12 = vweird.f32 %v2006_v50  ;;  %v885_v8 = vadd.f32 %v2433_v23, %v819_v49 }
 0x263   :  { %v1417_v59 = vpop.f32.mrf.mxu0  ;;  %v1076_v5 = vsel %vm2490_vm10, %v2002_v32, %v1072_v61  ;;  %v1084_v6 = vmul.f32 %v2008_v63, %v2452_v35  ;;  %2015 = vpow2.f32 %v1874_v2  ;;  %vm1089_vm14 = vweird.f32 %v2008_v63  ;;  %vm1652_vm15 = vmor %vm1650_vm7, %vm1651_vm12 }
 0x264   :  { %v1647_v60 = vsub.f32 1.0, %v1646_v52  ;;  %v1483_v62 = vadd.f32 %v1482_v41, %v1417_v59  ;;  %v1081_v11 = vsel %vm2479_vm8, %v1080_v58, %v1076_v5  ;;  %v1669_v20 = vand.u32 2147483647, %v2464_v45  ;;  %vm2530_vm2 = vmor %vm1088_vm11, %vm1089_vm14 }
 0x265   :  { %1211 = vst.msk [vmem:[%s2856_s3 + $0x38] sm:$0xff] %vm1203_vm5, %v1081_v11  ;;  %v1085_v17 = vsub.f32 1.0, %v1084_v6  ;;  %v1671_v21 = vand.u32 2147483648, %v2464_v45  ;;  %vm2519_vm0 = vcmp.eq.f32.partialorder %v1092_v0, 8.507059e+37  ;;  %v1095_v28 = vor.u32 1.1754944e-38, %v1094_v1 }
 0x266   :  { %v2010_v3 = vpop.eup %2009  ;;  %v1648_v4 = vmul.f32 %v2006_v50, %v1647_v60  ;;  %v1485_v7 = vpop.f32.mrf.mxu1  ;;  %v1920_v14 = vmul.f32 -1.442695, %v1483_v62  ;;  %v1875_v33 = vmul.f32 -1.442695, %v885_v8  ;;  %vm2540_vm3 = vcmp.eq.f32.partialorder %v1669_v20, 8.507059e+37 }
 0x267   :  { %v2012_v9 = vpop.eup %2011  ;;  %v2504_v12 = vadd.f32 1.0, %v2010_v3  ;;  %v1086_v26 = vmul.f32 %v2008_v63, %v1085_v17  ;;  %v1672_v36 = vor.u32 1.1754944e-38, %v1671_v21 }
 0x268   :  { %v1649_v15 = vadd.f32 %v2006_v50, %v1648_v4  ;;  %v1661_v16 = vmul.f32 %v2012_v9, %v2464_v45  ;;  %v2511_v18 = vpop.f32.mrf.mxu2  ;;  %v2014_v13 = vpop.eup %2013  ;;  %vm1666_vm1 = vweird.f32 %v2012_v9 }
 0x269   :  { %2017 = vrcp.f32 %v2504_v12  ;;  %v2523_v10 = vpop.f32.mrf.mxu3  ;;  %v2534_v29 = vadd.f32 1.0, %v2014_v13  ;;  %v1087_v32 = vadd.f32 %v2008_v63, %v1086_v26  ;;  %v2016_v34 = vpop.eup %2015  ;;  %v1684_v37 = vand.u32 2147483647, %v2504_v12  ;;  %vm1667_vm4 = vmor %vm1665_vm13, %vm1666_vm1 }
 0x26a   :  { %v1653_v24 = vsel %vm1652_vm15, %v2006_v50, %v1649_v15  ;;  %v1662_v25 = vsub.f32 1.0, %v1661_v16  ;;  %2019 = vpow2.f32 %v1920_v14  ;;  %v2548_v42 = vadd.f32 1.0, %v2016_v34 }
 0x26b   :  { %v1658_v19 = vsel %vm2483_vm9, %v1657_v53, %v1653_v24  ;;  %v1420_v30 = vpop.f32.mrf.mxu0  ;;  %2021 = vrcp.f32 %v2534_v29  ;;  %v1091_v39 = vsel %vm2530_vm2, %v2008_v63, %v1087_v32  ;;  %v1686_v47 = vand.u32 2147483648, %v2504_v12 }
 0x26c   :  { %1933 = vst.msk [vmem:[%s2856_s3 + $0xa8] sm:$0xff] %vm1203_vm5, %v1658_v19  ;;  %v1663_v31 = vmul.f32 %v2012_v9, %v1662_v25  ;;  %v1486_v22 = vadd.f32 %v1485_v7, %v1420_v30  ;;  %v1096_v48 = vsel %vm2519_vm0, %v1095_v28, %v1091_v39  ;;  %v1107_v49 = vand.u32 2147483647, %v2534_v29 }
 0x26d   :  { %2023 = vpow2.f32 %v1875_v33  ;;  %1212 = vst.msk [vmem:[%s2856_s3 + $0x40] sm:$0xff] %vm1203_vm5, %v1096_v48  ;;  %v1109_v45 = vand.u32 2147483648, %v2534_v29  ;;  %vm1680_vm6 = vweird.f32 %v2504_v12  ;;  %vm2573_vm7 = vcmp.eq.f32.partialorder %v1684_v37, 8.507059e+37 }
 0x26e   :  { %v1664_v38 = vadd.f32 %v2012_v9, %v1663_v31  ;;  %v1921_v41 = vmul.f32 -1.442695, %v1486_v22  ;;  %v1488_v43 = vpop.f32.mrf.mxu1  ;;  %v1687_v58 = vor.u32 1.1754944e-38, %v1686_v47  ;;  %vm1103_vm8 = vweird.f32 %v2534_v29 }
 0x26f   :  { %v2018_v44 = vpop.eup %2017  ;;  %vm2579_vm9 = vcmp.eq.f32.partialorder %v1107_v49, 8.507059e+37  ;;  %v1110_v63 = vor.u32 1.1754944e-38, %v1109_v45  ;;  %vm1118_vm11 = vweird.f32 %v2548_v42  ;;  %v1122_v2 = vand.u32 2147483647, %v2548_v42 }
 0x270   :  { %v2020_v50 = vpop.eup %2019  ;;  %v1668_v46 = vsel %vm1667_vm4, %v2012_v9, %v1664_v38  ;;  %v1676_v40 = vmul.f32 %v2018_v44, %v2504_v12  ;;  %2025 = vpow2.f32 %v1921_v41  ;;  %v825_v52 = vpop.f32.mrf.mxu2  ;;  %vm1681_vm10 = vweird.f32 %v2018_v44 }
 0x271   :  { %v1673_v54 = vsel %vm2540_vm3, %v1672_v36, %v1668_v46  ;;  %v2565_v55 = vadd.f32 1.0, %v2020_v50  ;;  %2027 = vrcp.f32 %v2548_v42  ;;  %v2022_v57 = vpop.eup %2021  ;;  %v893_v0 = vpop.f32.mrf.mxu3  ;;  %v1124_v3 = vand.u32 2147483648, %v2548_v42  ;;  %vm1682_vm13 = vmor %vm1680_vm6, %vm1681_vm10 }
 0x272   :  { %1934 = vst.msk [vmem:[%s2856_s3 + $0xb0] sm:$0xff] %vm1203_vm5, %v1673_v54  ;;  %v1677_v56 = vsub.f32 1.0, %v1676_v40  ;;  %v1099_v62 = vmul.f32 %v2022_v57, %v2534_v29  ;;  %vm1104_vm12 = vweird.f32 %v2022_v57  ;;  %v888_v9 = vadd.f32 %v2471_v51, %v2511_v18 }
 0x273   :  { %2029 = vrcp.f32 %v2565_v55  ;;  %v1423_v60 = vpop.f32.mrf.mxu0  ;;  %v2024_v1 = vpop.eup %2023  ;;  %v1699_v14 = vand.u32 2147483647, %v2565_v55  ;;  %v1701_v15 = vand.u32 2147483648, %v2565_v55  ;;  %vm1695_vm14 = vweird.f32 %v2565_v55  ;;  %vm2608_vm15 = vmor %vm1103_vm8, %vm1104_vm12 }
 0x274   :  { %v1678_v61 = vmul.f32 %v2018_v44, %v1677_v56  ;;  %v1489_v4 = vadd.f32 %v1488_v43, %v1423_v60  ;;  %v1100_v7 = vsub.f32 1.0, %v1099_v62  ;;  %v2600_v23 = vadd.f32 1.0, %v2024_v1 }
 0x275   :  { %vm2613_vm0 = vcmp.eq.f32.partialorder %v1122_v2, 8.507059e+37  ;;  %v1876_v27 = vmul.f32 -1.442695, %v888_v9  ;;  %v891_v28 = vadd.f32 %v2523_v10, %v825_v52  ;;  %vm2623_vm1 = vcmp.eq.f32.partialorder %v1699_v14, 8.507059e+37 }
 0x276   :  { %v2026_v5 = vpop.eup %2025  ;;  %v1679_v6 = vadd.f32 %v2018_v44, %v1678_v61  ;;  %v1491_v8 = vpop.f32.mrf.mxu1  ;;  %v1922_v17 = vmul.f32 -1.442695, %v1489_v4  ;;  %v1101_v20 = vmul.f32 %v2022_v57, %v1100_v7  ;;  %v1702_v22 = vor.u32 1.1754944e-38, %v1701_v15 }
 0x277   :  { %v2589_v11 = vpop.eup %2027  ;;  %v2596_v16 = vadd.f32 1.0, %v2026_v5  ;;  %v1125_v35 = vor.u32 1.1754944e-38, %v1124_v3  ;;  %v1877_v39 = vmul.f32 -1.442695, %v891_v28  ;;  %v1139_v3 = vand.u32 2147483648, %v2600_v23 }
 0x278   :  { %v1683_v13 = vsel %vm1682_vm13, %v2018_v44, %v1679_v6  ;;  %v1114_v21 = vmul.f32 %v2589_v11, %v2548_v42  ;;  %v828_v51 = vpop.f32.mrf.mxu2  ;;  %v1102_v19 = vadd.f32 %v2022_v57, %v1101_v20  ;;  %vm1119_vm2 = vweird.f32 %v2589_v11 }
 0x279   :  { %v2030_v18 = vpop.eup %2029  ;;  %v1688_v12 = vsel %vm2573_vm7, %v1687_v58, %v1683_v13  ;;  %2031 = vrcp.f32 %v2596_v16  ;;  %vm1710_vm4 = vweird.f32 %v2596_v16  ;;  %vm2641_vm6 = vmor %vm1118_vm11, %vm1119_vm2  ;;  %v896_v41 = vpop.f32.mrf.mxu3  ;;  %v1714_v44 = vand.u32 2147483647, %v2596_v16 }
 0x27a   :  { %1935 = vst.msk [vmem:[%s2856_s3 + $0xb8] sm:$0xff] %vm1203_vm5, %v1688_v12  ;;  %v1691_v26 = vmul.f32 %v2030_v18, %v2565_v55  ;;  %v1115_v30 = vsub.f32 1.0, %v1114_v21  ;;  %2033 = vpow2.f32 %v1922_v17  ;;  %v1106_v33 = vsel %vm2608_vm15, %v2022_v57, %v1102_v19 }
 0x27b   :  { %v1426_v31 = vpop.f32.mrf.mxu0  ;;  %2035 = vrcp.f32 %v2600_v23  ;;  %vm1696_vm3 = vweird.f32 %v2030_v18  ;;  %v1111_v10 = vsel %vm2579_vm9, %v1110_v63, %v1106_v33  ;;  %v1716_v47 = vand.u32 2147483648, %v2596_v16 }
 0x27c   :  { %v1692_v32 = vsub.f32 1.0, %v1691_v26  ;;  %v1116_v34 = vmul.f32 %v2589_v11, %v1115_v30  ;;  %1213 = vst.msk [vmem:[%s2856_s3 + $0x48] sm:$0xff] %vm1203_vm5, %v1111_v10  ;;  %v1492_v38 = vadd.f32 %v1491_v8, %v1426_v31  ;;  %2037 = vpow2.f32 %v1876_v27  ;;  %vm1697_vm8 = vmor %vm1695_vm14, %vm1696_vm3 }
 0x27d   :  { %v894_v49 = vadd.f32 %v893_v0, %v828_v51  ;;  %vm1133_vm7 = vweird.f32 %v2600_v23  ;;  %2039 = vpow2.f32 %v1877_v39  ;;  %v1137_v63 = vand.u32 2147483647, %v2600_v23 }
 0x27e   :  { %v1693_v36 = vmul.f32 %v2030_v18, %v1692_v32  ;;  %v1117_v48 = vadd.f32 %v2589_v11, %v1116_v34  ;;  %v1923_v42 = vmul.f32 -1.442695, %v1492_v38  ;;  %v1494_v40 = vpop.f32.mrf.mxu1  ;;  %vm1715_vm11 = vcmp.eq.f32.partialorder %v1714_v44, 8.507059e+37 }
 0x27f   :  { %v2032_v43 = vpop.eup %2031  ;;  %v1878_v56 = vmul.f32 -1.442695, %v894_v49  ;;  %vm2678_vm13 = vcmp.eq.f32.partialorder %v1137_v63, 8.507059e+37 }
 0x280   :  { %v1694_v50 = vadd.f32 %v2030_v18, %v1693_v36  ;;  %v1706_v46 = vmul.f32 %v2032_v43, %v2596_v16  ;;  %v831_v45 = vpop.f32.mrf.mxu2  ;;  %v2034_v52 = vpop.eup %2033  ;;  %v1121_v54 = vsel %vm2641_vm6, %v2589_v11, %v1117_v48  ;;  %2041 = vpow2.f32 %v1923_v42 }
 0x281   :  { %v897_v53 = vadd.f32 %v896_v41, %v831_v45  ;;  %v2036_v57 = vpop.eup %2035  ;;  %v1126_v60 = vsel %vm2613_vm0, %v1125_v35, %v1121_v54  ;;  %v2658_v61 = vadd.f32 1.0, %v2034_v52  ;;  %vm1711_vm9 = vweird.f32 %v2032_v43 }
 0x282   :  { %v1698_v58 = vsel %vm1697_vm8, %v2030_v18, %v1694_v50  ;;  %v1707_v59 = vsub.f32 1.0, %v1706_v46  ;;  %1214 = vst.msk [vmem:[%s2856_s3 + $0x50] sm:$0xff] %vm1203_vm5, %v1126_v60  ;;  %v1129_v55 = vmul.f32 %v2036_v57, %v2600_v23  ;;  %v2038_v1 = vpop.eup %2037  ;;  %vm1134_vm10 = vweird.f32 %v2036_v57  ;;  %vm1712_vm12 = vmor %vm1710_vm4, %vm1711_vm9 }
 0x283   :  { %v1703_v62 = vsel %vm2623_vm1, %v1702_v22, %v1698_v58  ;;  %v1429_v0 = vpop.f32.mrf.mxu0  ;;  %2043 = vrcp.f32 %v2658_v61  ;;  %v2674_v5 = vadd.f32 1.0, %v2038_v1  ;;  %v1879_v8 = vmul.f32 -1.442695, %v897_v53  ;;  %v2040_v9 = vpop.eup %2039  ;;  %vm2687_vm14 = vmor %vm1133_vm7, %vm1134_vm10 }
 0x284   :  { %1936 = vst.msk [vmem:[%s2856_s3 + $0xc0] sm:$0xff] %vm1203_vm5, %v1703_v62  ;;  %v1708_v2 = vmul.f32 %v2032_v43, %v1707_v59  ;;  %v1130_v4 = vsub.f32 1.0, %v1129_v55  ;;  %v1495_v6 = vadd.f32 %v1494_v40, %v1429_v0  ;;  %2045 = vpow2.f32 %v1878_v56 }
 0x285   :  { %v1717_v11 = vor.u32 1.1754944e-38, %v1716_v47  ;;  %2047 = vrcp.f32 %v2674_v5  ;;  %v1729_v13 = vand.u32 2147483647, %v2658_v61  ;;  %v1140_v16 = vor.u32 1.1754944e-38, %v1139_v3 }
 0x286   :  { %v1709_v7 = vadd.f32 %v2032_v43, %v1708_v2  ;;  %v1131_v14 = vmul.f32 %v2036_v57, %v1130_v4  ;;  %v1924_v21 = vmul.f32 -1.442695, %v1495_v6  ;;  %v2042_v51 = vpop.eup %2041  ;;  %v2691_v24 = vadd.f32 1.0, %v2040_v9  ;;  %v1497_v27 = vpop.f32.mrf.mxu1 }
 0x287   :  { %2049 = vpow2.f32 %v1879_v8  ;;  %v1731_v23 = vand.u32 2147483648, %v2658_v61  ;;  %v2698_v26 = vadd.f32 1.0, %v2042_v51  ;;  %v1152_v19 = vand.u32 2147483647, %v2674_v5 }
 0x288   :  { %v1713_v17 = vsel %vm1712_vm12, %v2032_v43, %v1709_v7  ;;  %v1132_v12 = vadd.f32 %v2036_v57, %v1131_v14  ;;  %2051 = vpow2.f32 %v1924_v21  ;;  %v1154_v30 = vand.u32 2147483648, %v2674_v5 }
 0x289   :  { %v1718_v18 = vsel %vm1715_vm11, %v1717_v11, %v1713_v17  ;;  %v2044_v25 = vpop.eup %2043  ;;  %2053 = vrcp.f32 %v2691_v24  ;;  %vm1725_vm15 = vweird.f32 %v2658_v61  ;;  %vm2710_vm0 = vcmp.eq.f32.partialorder %v1729_v13, 8.507059e+37 }
 0x28a   :  { %1937 = vst.msk [vmem:[%s2856_s3 + $0xc8] sm:$0xff] %vm1203_vm5, %v1718_v18  ;;  %v1721_v28 = vmul.f32 %v2044_v25, %v2658_v61  ;;  %v1136_v29 = vsel %vm2687_vm14, %v2036_v57, %v1132_v12  ;;  %v2046_v32 = vpop.eup %2045  ;;  %2055 = vrcp.f32 %v2698_v26  ;;  %v1732_v35 = vor.u32 1.1754944e-38, %v1731_v23 }
 0x28b   :  { %v1432_v31 = vpop.f32.mrf.mxu0  ;;  %v1141_v22 = vsel %vm2678_vm13, %v1140_v16, %v1136_v29  ;;  %v2048_v33 = vpop.eup %2047  ;;  %vm1148_vm1 = vweird.f32 %v2674_v5  ;;  %vm2720_vm2 = vcmp.eq.f32.partialorder %v1152_v19, 8.507059e+37  ;;  %vm1726_vm3 = vweird.f32 %v2044_v25 }
 0x28c   :  { %v1722_v10 = vsub.f32 1.0, %v1721_v28  ;;  %1215 = vst.msk [vmem:[%s2856_s3 + $0x58] sm:$0xff] %vm1203_vm5, %v1141_v22  ;;  %v1144_v36 = vmul.f32 %v2048_v33, %v2674_v5  ;;  %v1155_v41 = vor.u32 1.1754944e-38, %v1154_v30  ;;  %v1498_v43 = vadd.f32 %v1497_v27, %v1432_v31  ;;  %vm1727_vm7 = vmor %vm1725_vm15, %vm1726_vm3 }
 0x28d   :  { %v2050_v38 = vpop.eup %2049  ;;  %v1744_v47 = vand.u32 2147483647, %v2698_v26  ;;  %vm1149_vm4 = vweird.f32 %v2048_v33  ;;  %v2725_v49 = vadd.f32 1.0, %v2046_v32  ;;  %vm1740_vm6 = vweird.f32 %v2698_v26 }
 0x28e   :  { %v1723_v39 = vmul.f32 %v2044_v25, %v1722_v10  ;;  %v2052_v44 = vpop.eup %2051  ;;  %v1145_v48 = vsub.f32 1.0, %v1144_v36  ;;  %v1746_v42 = vand.u32 2147483648, %v2698_v26  ;;  %v1925_v45 = vmul.f32 -1.442695, %v1498_v43  ;;  %vm2741_vm8 = vmor %vm1148_vm1, %vm1149_vm4  ;;  %v1500_v63 = vpop.f32.mrf.mxu1 }
 0x28f   :  { %v2054_v50 = vpop.eup %2053  ;;  %v2729_v40 = vadd.f32 1.0, %v2052_v44  ;;  %v1167_v53 = vand.u32 2147483647, %v2691_v24  ;;  %2057 = vrcp.f32 %v2725_v49  ;;  %vm1163_vm9 = vweird.f32 %v2691_v24 }
 0x290   :  { %v1724_v46 = vadd.f32 %v2044_v25, %v1723_v39  ;;  %v2056_v52 = vpop.eup %2055  ;;  %v1146_v54 = vmul.f32 %v2048_v33, %v1145_v48  ;;  %v1159_v56 = vmul.f32 %v2054_v50, %v2691_v24  ;;  %v1169_v62 = vand.u32 2147483648, %v2691_v24 }
 0x291   :  { %v1736_v58 = vmul.f32 %v2056_v52, %v2698_v26  ;;  %2059 = vrcp.f32 %v2729_v40  ;;  %v2750_v0 = vadd.f32 1.0, %v2050_v38  ;;  %vm1164_vm10 = vweird.f32 %v2054_v50 }
 0x292   :  { %v1728_v57 = vsel %vm1727_vm7, %v2044_v25, %v1724_v46  ;;  %v1147_v61 = vadd.f32 %v2048_v33, %v1146_v54  ;;  %v1160_v2 = vsub.f32 1.0, %v1159_v56  ;;  %2061 = vpow2.f32 %v1925_v45  ;;  %vm2775_vm14 = vmor %vm1163_vm9, %vm1164_vm10 }
 0x293   :  { %v1733_v60 = vsel %vm2710_vm0, %v1732_v35, %v1728_v57  ;;  %v1435_v55 = vpop.f32.mrf.mxu0  ;;  %v1737_v1 = vsub.f32 1.0, %v1736_v58  ;;  %vm2756_vm11 = vcmp.eq.f32.partialorder %v1744_v47, 8.507059e+37  ;;  %v1747_v4 = vor.u32 1.1754944e-38, %v1746_v42 }
 0x294   :  { %1938 = vst.msk [vmem:[%s2856_s3 + $0xd0] sm:$0xff] %vm1203_vm5, %v1733_v60  ;;  %v1151_v5 = vsel %vm2741_vm8, %v2048_v33, %v1147_v61  ;;  %vm2762_vm12 = vcmp.eq.f32.partialorder %v1167_v53, 8.507059e+37  ;;  %vm1741_vm13 = vweird.f32 %v2056_v52  ;;  %v1161_v9 = vmul.f32 %v2054_v50, %v1160_v2 }
 0x295   :  { %v1738_v7 = vmul.f32 %v2056_v52, %v1737_v1  ;;  %v1156_v8 = vsel %vm2720_vm2, %v1155_v41, %v1151_v5  ;;  %v2058_v11 = vpop.eup %2057  ;;  %v1761_v14 = vand.u32 2147483648, %v2729_v40  ;;  %v1170_v17 = vor.u32 1.1754944e-38, %v1169_v62  ;;  %vm1742_vm0 = vmor %vm1740_vm6, %vm1741_vm13 }
 0x296   :  { %1216 = vst.msk [vmem:[%s2856_s3 + $0x60] sm:$0xff] %vm1203_vm5, %v1156_v8  ;;  %v1501_v13 = vadd.f32 %v1500_v63, %v1435_v55  ;;  %2063 = vrcp.f32 %v2750_v0  ;;  %v1162_v21 = vadd.f32 %v2054_v50, %v1161_v9  ;;  %v1174_v51 = vmul.f32 %v2058_v11, %v2725_v49  ;;  %v1503_v37 = vpop.f32.mrf.mxu1 }
 0x297   :  { %v2060_v20 = vpop.eup %2059  ;;  %v1739_v16 = vadd.f32 %v2056_v52, %v1738_v7  ;;  %vm1178_vm15 = vweird.f32 %v2725_v49  ;;  %v1182_v12 = vand.u32 2147483647, %v2725_v49  ;;  %v1184_v24 = vand.u32 2147483648, %v2725_v49 }
 0x298   :  { %v1751_v18 = vmul.f32 %v2060_v20, %v2729_v40  ;;  %v1926_v25 = vmul.f32 -1.442695, %v1501_v13  ;;  %v2062_v23 = vpop.eup %2061  ;;  %v1166_v27 = vsel %vm2775_vm14, %v2054_v50, %v1162_v21  ;;  %v1175_v28 = vsub.f32 1.0, %v1174_v51 }
 0x299   :  { %v1743_v19 = vsel %vm1742_vm0, %v2056_v52, %v1739_v16  ;;  %vm1179_vm1 = vweird.f32 %v2058_v11  ;;  %v1171_v26 = vsel %vm2762_vm12, %v1170_v17, %v1166_v27  ;;  %v2794_v31 = vadd.f32 1.0, %v2062_v23 }
 0x29a   :  { %v1748_v29 = vsel %vm2756_vm11, %v1747_v4, %v1743_v19  ;;  %v1752_v30 = vsub.f32 1.0, %v1751_v18  ;;  %vm1755_vm2 = vweird.f32 %v2729_v40  ;;  %v1759_v32 = vand.u32 2147483647, %v2729_v40  ;;  %1217 = vst.msk [vmem:[%s2856_s3 + $0x68] sm:$0xff] %vm1203_vm5, %v1171_v26  ;;  %vm2810_vm4 = vmor %vm1178_vm15, %vm1179_vm1 }
 0x29b   :  { %1939 = vst.msk [vmem:[%s2856_s3 + $0xd8] sm:$0xff] %vm1203_vm5, %v1748_v29  ;;  %v1176_v22 = vmul.f32 %v2058_v11, %v1175_v28  ;;  %2065 = vpow2.f32 %v1926_v25  ;;  %vm1756_vm3 = vweird.f32 %v2060_v20  ;;  %v1185_v35 = vor.u32 1.1754944e-38, %v1184_v24  ;;  %v1438_v36 = vpop.f32.mrf.mxu0 }
 0x29c   :  { %v2064_v33 = vpop.eup %2063  ;;  %v1753_v10 = vmul.f32 %v2060_v20, %v1752_v30  ;;  %2067 = vrcp.f32 %v2794_v31  ;;  %v1762_v38 = vor.u32 1.1754944e-38, %v1761_v14  ;;  %vm1183_vm6 = vcmp.eq.f32.partialorder %v1182_v12, 8.507059e+37  ;;  %vm1757_vm8 = vmor %vm1755_vm2, %vm1756_vm3 }
 0x29d   :  { %v1177_v39 = vadd.f32 %v2058_v11, %v1176_v22  ;;  %v1189_v41 = vmul.f32 %v2064_v33, %v2750_v0  ;;  %vm1193_vm7 = vweird.f32 %v2750_v0  ;;  %v1197_v44 = vand.u32 2147483647, %v2750_v0 }
 0x29e   :  { %v1754_v43 = vadd.f32 %v2060_v20, %v1753_v10  ;;  %v1199_v47 = vand.u32 2147483648, %v2750_v0  ;;  %vm1194_vm9 = vweird.f32 %v2064_v33  ;;  %v1504_v50 = vadd.f32 %v1503_v37, %v1438_v36 }
 0x29f   :  { %v1181_v48 = vsel %vm2810_vm4, %v2058_v11, %v1177_v39  ;;  %v1190_v49 = vsub.f32 1.0, %v1189_v41  ;;  %vm1760_vm10 = vcmp.eq.f32.partialorder %v1759_v32, 8.507059e+37  ;;  %vm1195_vm11 = vmor %vm1193_vm7, %vm1194_vm9  ;;  %vm1198_vm12 = vcmp.eq.f32.partialorder %v1197_v44, 8.507059e+37 }
 0x2a0   :  { %v1758_v46 = vsel %vm1757_vm8, %v2060_v20, %v1754_v43  ;;  %v1186_v42 = vsel %vm1183_vm6, %v1185_v35, %v1181_v48  ;;  %v1927_v56 = vmul.f32 -1.442695, %v1504_v50  ;;  %v1200_v57 = vor.u32 1.1754944e-38, %v1199_v47 }
 0x2a1   :  { %v2066_v45 = vpop.eup %2065  ;;  %v1763_v52 = vsel %vm1760_vm10, %v1762_v38, %v1758_v46  ;;  %1218 = vst.msk [vmem:[%s2856_s3 + $0x70] sm:$0xff] %vm1203_vm5, %v1186_v42  ;;  %v1191_v54 = vmul.f32 %v2064_v33, %v1190_v49  ;;  %v1776_v62 = vand.u32 2147483648, %v2794_v31  ;;  %v1774_v1 = vand.u32 2147483647, %v2794_v31 }
 0x2a2   :  { %v2068_v40 = vpop.eup %2067  ;;  %1940 = vst.msk [vmem:[%s2856_s3 + $0xe0] sm:$0xff] %vm1203_vm5, %v1763_v52  ;;  %v1568_v53 = vadd.f32 1.0, %v2066_v45  ;;  %2069 = vpow2.f32 %v1927_v56  ;;  %vm1770_vm14 = vweird.f32 %v2794_v31 }
 0x2a3   :  { %v1766_v58 = vmul.f32 %v2068_v40, %v2794_v31  ;;  %v1192_v59 = vadd.f32 %v2064_v33, %v1191_v54  ;;  %vm1771_vm13 = vweird.f32 %v2068_v40  ;;  %v1777_v4 = vor.u32 1.1754944e-38, %v1776_v62 }
 0x2a4   :  { %2071 = vrcp.f32 %v1568_v53  ;;  %vm1772_vm15 = vmor %vm1770_vm14, %vm1771_vm13  ;;  %vm1775_vm0 = vcmp.eq.f32.partialorder %v1774_v1, 8.507059e+37  ;;  %v1791_v11 = vand.u32 2147483648, %v1568_v53  ;;  %v1789_v15 = vand.u32 2147483647, %v1568_v53 }
 0x2a5   :  { %v1767_v60 = vsub.f32 1.0, %v1766_v58  ;;  %v1196_v61 = vsel %vm1195_vm11, %v2064_v33, %v1192_v59  ;;  %vm1785_vm2 = vweird.f32 %v1568_v53 }
 0x2a6   :  { %v1201_v55 = vsel %vm1198_vm12, %v1200_v57, %v1196_v61  ;;  %v1792_v20 = vor.u32 1.1754944e-38, %v1791_v11  ;;  %vm1790_vm4 = vcmp.eq.f32.partialorder %v1789_v15, 8.507059e+37 }
 0x2a7   :  { %v1768_v63 = vmul.f32 %v2068_v40, %v1767_v60  ;;  %1219 = vst.msk [vmem:[%s2856_s3 + $0x78] sm:$0xff] %vm1203_vm5, %v1201_v55 }
 0x2a8   :  { %v2070_v0 = vpop.eup %2069 }
 0x2a9   :  { %v1769_v2 = vadd.f32 %v2068_v40, %v1768_v63  ;;  %v1569_v5 = vadd.f32 1.0, %v2070_v0 }
 0x2aa   :  { %v2072_v3 = vpop.eup %2071 }
 0x2ab   :  { %v1773_v6 = vsel %vm1772_vm15, %v2068_v40, %v1769_v2  ;;  %v1781_v7 = vmul.f32 %v2072_v3, %v1568_v53  ;;  %2073 = vrcp.f32 %v1569_v5  ;;  %vm1786_vm1 = vweird.f32 %v2072_v3 }
 0x2ac   :  { %v1778_v8 = vsel %vm1775_vm0, %v1777_v4, %v1773_v6  ;;  %vm1787_vm3 = vmor %vm1785_vm2, %vm1786_vm1  ;;  %v1806_v12 = vand.u32 2147483648, %v1569_v5  ;;  %v1804_v25 = vand.u32 2147483647, %v1569_v5  ;;  %vm1800_vm7 = vweird.f32 %v1569_v5 }
 0x2ad   :  { %1941 = vst.msk [vmem:[%s2856_s3 + $0xe8] sm:$0xff] %vm1203_vm5, %v1778_v8  ;;  %v1782_v9 = vsub.f32 1.0, %v1781_v7 }
 0x2ae   :  { %v1807_v19 = vor.u32 1.1754944e-38, %v1806_v12  ;;  %vm1805_vm9 = vcmp.eq.f32.partialorder %v1804_v25, 8.507059e+37 }
 0x2af   :  { %v1783_v14 = vmul.f32 %v2072_v3, %v1782_v9 }
 0x2b1   :  { %v1784_v17 = vadd.f32 %v2072_v3, %v1783_v14  ;;  %v2074_v13 = vpop.eup %2073 }
 0x2b2   :  { %v1796_v21 = vmul.f32 %v2074_v13, %v1569_v5  ;;  %vm1801_vm6 = vweird.f32 %v2074_v13 }
 0x2b3   :  { %v1788_v16 = vsel %vm1787_vm3, %v2072_v3, %v1784_v17  ;;  %vm1802_vm8 = vmor %vm1800_vm7, %vm1801_vm6 }
 0x2b4   :  { %v1793_v51 = vsel %vm1790_vm4, %v1792_v20, %v1788_v16  ;;  %v1797_v18 = vsub.f32 1.0, %v1796_v21 }
 0x2b5   :  { %1942 = vst.msk [vmem:[%s2856_s3 + $0xf0] sm:$0xff] %vm1203_vm5, %v1793_v51 }
 0x2b6   :  { %v1798_v24 = vmul.f32 %v2074_v13, %v1797_v18 }
 0x2b8   :  { %v1799_v23 = vadd.f32 %v2074_v13, %v1798_v24 }
 0x2ba   :  { %v1803_v27 = vsel %vm1802_vm8, %v2074_v13, %v1799_v23 }
 0x2bb   :  { %v1808_v28 = vsel %vm1805_vm9, %v1807_v19, %v1803_v27 }
 0x2bc   :  { %1943 = vst.msk [vmem:[%s2856_s3 + $0xf8] sm:$0xff] %vm1203_vm5, %v1808_v28 }
 0x2bd   :  { %1831 = vsyncpa [#allocation5], 1 }

</bundles_post_ra>
